<compile_context>
chip_gen: v7x
topology: tpu7x:2x2x1
jax: 0.10.0
libtpu: 0.0.40
codegen_flags: <defaults>
</compile_context>

<pallas_src>
import functools
import math

import jax
import jax.numpy as jnp
from jax import lax
from jax.experimental import pallas as pl
from jax.experimental.pallas import tpu as pltpu


def _round_up(x, m):
    return (x + m - 1) // m * m


def gconv_kernel(E_real, TE, NP,
                 nf_ref, ef_ref, s_col_ref, e_col_ref, s_row_ref,   # inputs
                 we1_ref, we2_ref, we3_ref, be_ref,
                 wi_ref, bi_ref,
                 wn1_ref, wn2_ref, bn_ref,
                 out_ref,                                           # output
                 agg_ref):                                          # VMEM scratch
    pid = pl.program_id(0)
    nsteps = pl.num_programs(0)
    bf16 = jnp.bfloat16

    nf = nf_ref[...]                      # [NP, DN] f32 (resident across grid)
    nf_b = nf.astype(bf16)

    # ---- prologue (pid == 0): init accumulator; hoist the edge-independent
    # half of node_func so it overlaps with later edge-tile DMAs. ----
    @pl.when(pid == 0)
    def _prologue():
        agg_ref[...] = jnp.zeros_like(agg_ref)
        out_ref[...] = (nf
                        + jnp.dot(nf_b, wn1_ref[...],
                                  preferred_element_type=jnp.float32)
                        + bn_ref[...])

    # ---- gather endpoint node rows via bf16 one-hot MXU matmuls (no loop) ----
    lane_iota = lax.broadcasted_iota(jnp.int32, (TE, NP), 1)     # node id / lane
    oh_s = (lane_iota == s_col_ref[...]).astype(bf16)            # [TE, NP]
    oh_e = (lane_iota == e_col_ref[...]).astype(bf16)            # [TE, NP]
    gs = jnp.dot(oh_s, nf_b, preferred_element_type=jnp.float32).astype(bf16)
    ge = jnp.dot(oh_e, nf_b, preferred_element_type=jnp.float32).astype(bf16)
    ef = ef_ref[...]                                             # [TE, DE] bf16

    # ---- edge_func(cat([nf[start], nf[end], ef])): bf16 MXU, f32 accum ----
    msg = (jnp.dot(gs, we1_ref[...], preferred_element_type=jnp.float32)
           + jnp.dot(ge, we2_ref[...], preferred_element_type=jnp.float32)
           + jnp.dot(ef, we3_ref[...], preferred_element_type=jnp.float32)
           + be_ref[...])
    msg = jnp.maximum(msg, 0.0)                                  # ReLU (f32 VPU)

    # ---- infer_edges gate: Linear(Dm->1)+sigmoid as VPU reduce + EUP ----
    logits = jnp.sum(msg * wi_ref[...], axis=-1, keepdims=True) + bi_ref[0, 0]
    msg = msg * jax.nn.sigmoid(logits)                           # [TE, DM] f32

    # ---- zero out padded edge rows (global edge id >= real E) ----
    eidx = pid * TE + lax.broadcasted_iota(jnp.int32, (TE, 1), 0)
    msg = msg * (eidx < E_real).astype(jnp.float32)

    # ---- scatter-sum onto nodes via transposed one-hot (bf16 MXU, f32 acc) ----
    node_iota = lax.broadcasted_iota(jnp.int32, (NP, TE), 0)
    oh_t = (node_iota == s_row_ref[...]).astype(bf16)            # [NP, TE]
    agg_ref[...] += jnp.dot(oh_t, msg.astype(bf16),
                            preferred_element_type=jnp.float32)

    # ---- epilogue: add the edge-dependent half of node_func, written once ----
    @pl.when(pid == nsteps - 1)
    def _finalize():
        out_ref[...] += jnp.dot(agg_ref[...].astype(bf16), wn2_ref[...],
                                preferred_element_type=jnp.float32)


def graph_convolution(node_features, edge_indices, edge_features, params,
                      *, edge_tile=256):
    """Returns (new_node_features, edge_indices, edge_features)."""
    N, Dn = node_features.shape
    E, De = edge_features.shape
    Dm = params["we1"].shape[1]

    f32, bf16 = jnp.float32, jnp.bfloat16
    NP = _round_up(N, 16)         # sublane-aligned (bf16-packing friendly)
    DN = _round_up(Dn, 128)       # lane-dense feature dims
    DE = _round_up(De, 128)
    DM = _round_up(Dm, 128)
    TE = edge_tile
    EP = _round_up(max(E, 1), TE)

    def pad2(x, rows, cols, dtype=f32):
        x = x.astype(f32)
        x = jnp.pad(x, ((0, rows - x.shape[0]), (0, cols - x.shape[1])))
        return x.astype(dtype)

    nf_p = pad2(node_features, NP, DN)                 # f32 (residual add)
    ef_p = pad2(edge_features, EP, DE, bf16)           # bf16 MXU operand

    # Indices are streamed per-tile (no whole-graph SMEM prefetch).  Padded
    # edges get index NP, which matches no node row: their one-hot rows are
    # all-zero, so they gather zeros and scatter nothing (plus an explicit
    # message mask inside the kernel).
    start = edge_indices[0].astype(jnp.int32)
    end = edge_indices[1].astype(jnp.int32)
    start_p = jnp.pad(start, (0, EP - E), constant_values=NP)
    end_p = jnp.pad(end, (0, EP - E), constant_values=NP)
    s_col = start_p.reshape(EP, 1)                     # gather one-hot layout
    e_col = end_p.reshape(EP, 1)
    s_row = start_p.reshape(1, EP)                     # scatter one-hot layout

    we1 = pad2(params["we1"], DN, DM, bf16)
    we2 = pad2(params["we2"], DN, DM, bf16)
    we3 = pad2(params["we3"], DE, DM, bf16)
    be = pad2(params["be"], 1, DM)                     # f32 (VPU add)
    wi = pad2(params["wi"], 1, DM)                     # f32 (VPU reduce)
    bi = params["bi"].astype(f32).reshape(1, 1)        # SMEM scalar
    wn1 = pad2(params["wn1"], DN, DN, bf16)
    wn2 = pad2(params["wn2"], DM, DN, bf16)
    bn = pad2(params["bn"], 1, DN)                     # f32

    grid = (EP // TE,)

    def const(i):
        return (0, 0)

    in_specs = [
        pl.BlockSpec((NP, DN), const),                      # node features (resident)
        pl.BlockSpec((TE, DE), lambda i: (i, 0)),           # edge feature tile
        pl.BlockSpec((TE, 1), lambda i: (i, 0)),            # start indices (column)
        pl.BlockSpec((TE, 1), lambda i: (i, 0)),            # end indices (column)
        pl.BlockSpec((1, TE), lambda i: (0, i)),            # start indices (row)
        pl.BlockSpec((DN, DM), const),                      # we1
        pl.BlockSpec((DN, DM), const),                      # we2
        pl.BlockSpec((DE, DM), const),                      # we3
        pl.BlockSpec((1, DM), const),                       # be
        pl.BlockSpec((1, DM), const),                       # wi
        pl.BlockSpec(memory_space=pltpu.MemorySpace.SMEM),  # bi (scalar)
        pl.BlockSpec((DN, DN), const),                      # wn1
        pl.BlockSpec((DM, DN), const),                      # wn2
        pl.BlockSpec((1, DN), const),                       # bn
    ]

    grid_spec = pltpu.PrefetchScalarGridSpec(
        num_scalar_prefetch=0,
        grid=grid,
        in_specs=in_specs,
        out_specs=pl.BlockSpec((NP, DN), const),
        scratch_shapes=[pltpu.VMEM((NP, DM), f32)],         # agg accumulator
    )

    # --- VMEM budget derived from actual block sizes (per-generation cap) ---
    def _bytes(shape, dtype):
        return math.prod(shape) * jnp.dtype(dtype).itemsize

    streamed = (_bytes((TE, DE), bf16) + 2 * _bytes((TE, 1), jnp.int32)
                + _bytes((1, TE), jnp.int32))
    resident = (_bytes((NP, DN), f32)                       # nf
                + 2 * _bytes((DN, DM), bf16) + _bytes((DE, DM), bf16)
                + 2 * _bytes((1, DM), f32)
                + _bytes((DN, DN), bf16) + _bytes((DM, DN), bf16)
                + _bytes((1, DN), f32)
                + _bytes((NP, DN), f32))                    # out block
    scratch = _bytes((NP, DM), f32)
    vmem_needed = 2 * (streamed + resident) + scratch       # double-buffered blocks
    try:
        phys_vmem = getattr(pltpu.get_tpu_info(), "vmem_capacity_bytes",
                            64 * 1024 * 1024)
    except Exception:  # pragma: no cover - conservative fallback
        phys_vmem = 64 * 1024 * 1024
    vmem_limit = max(32 * 1024 * 1024,
                     min(2 * vmem_needed, int(0.75 * phys_vmem)))

    flops = (4 * EP * NP * DN                   # one-hot gathers (start, end)
             + 2 * EP * DM * (2 * DN + DE)      # edge_func matmuls
             + 2 * EP * DM                      # gate reduce
             + 2 * NP * EP * DM                 # one-hot scatter matmul
             + 2 * NP * DN * (DN + DM))         # node_func matmuls
    bytes_accessed = (4 * NP * DN + 2 * EP * DE + 4 * 3 * EP
                      + 2 * (2 * DN * DM + DE * DM + DN * DN + DM * DN)
                      + 4 * (2 * DM + 1 + DN) + 4 * NP * DN)
    cost = pl.CostEstimate(flops=int(flops), transcendentals=int(EP),
                           bytes_accessed=int(bytes_accessed))

    kernel = functools.partial(gconv_kernel, E, TE, NP)

    out_p = pl.pallas_call(
        kernel,
        grid_spec=grid_spec,
        out_shape=jax.ShapeDtypeStruct((NP, DN), f32),
        compiler_params=pltpu.CompilerParams(
            dimension_semantics=("arbitrary",),     # edge axis is a reduction
            vmem_limit_bytes=int(vmem_limit),
        ),
        cost_estimate=cost,
    )(nf_p, ef_p, s_col, e_col, s_row,
      we1, we2, we3, be, wi, bi, wn1, wn2, bn)

    new_nf = out_p[:N, :Dn]
    return new_nf, edge_indices, edge_features


def init_params(key, Dn, De, Dm):
    """Deterministic Linear-layer params (PyTorch-style uniform init)."""
    ks = jax.random.split(key, 9)

    def lin(k, fan_in, shape):
        bound = 1.0 / jnp.sqrt(fan_in)
        return jax.random.uniform(k, shape, jnp.float32, -bound, bound)

    fan_edge = 2 * Dn + De
    fan_node = Dn + Dm
    return {
        # edge_func weight split over the concat: [nf[start] | nf[end] | ef]
        "we1": lin(ks[0], fan_edge, (Dn, Dm)),
        "we2": lin(ks[1], fan_edge, (Dn, Dm)),
        "we3": lin(ks[2], fan_edge, (De, Dm)),
        "be":  lin(ks[3], fan_edge, (1, Dm)),
        # infer_edges_func: Linear(Dm -> 1), weight kept as a [1, Dm] row
        "wi":  lin(ks[4], Dm, (1, Dm)),
        "bi":  lin(ks[5], Dm, (1, 1)),
        # node_func weight split over the concat: [nf | agg]
        "wn1": lin(ks[6], fan_node, (Dn, Dn)),
        "wn2": lin(ks[7], fan_node, (Dm, Dn)),
        "bn":  lin(ks[8], fan_node, (1, Dn)),
    }


def reference(node_features, edge_indices, edge_features, params):
    """Pure-JAX f32 reference mirroring the PyTorch forward."""
    start, end = edge_indices[0], edge_indices[1]
    g_s = node_features[start]
    g_e = node_features[end]
    msg = (g_s @ params["we1"] + g_e @ params["we2"]
           + edge_features @ params["we3"] + params["be"])
    msg = jnp.maximum(msg, 0.0)
    gate = jax.nn.sigmoid(
        jnp.sum(msg * params["wi"], axis=-1, keepdims=True) + params["bi"][0, 0])
    msg = msg * gate
    agg = jnp.zeros((node_features.shape[0], msg.shape[1]), jnp.float32)
    agg = agg.at[start].add(msg)
    upd = node_features @ params["wn1"] + agg @ params["wn2"] + params["bn"]
    return node_features + upd


if __name__ == "__main__":
    N, Dn = 24, 32          # nodes, node-feature dim
    E, De = 300, 32         # edges, edge-feature dim (spans 2 edge tiles)
    Dm = 48                 # message dim

    key = jax.random.PRNGKey(0)
    k_nf, k_ef, k_s, k_e, k_p = jax.random.split(key, 5)

    node_features = jax.random.normal(k_nf, (N, Dn), jnp.float32)
    edge_features = jax.random.normal(k_ef, (E, De), jnp.float32)
    start = jax.random.randint(k_s, (E,), 0, N, jnp.int32)
    end = jax.random.randint(k_e, (E,), 0, N, jnp.int32)
    edge_indices = jnp.stack([start, end], axis=0)          # [2, E]

    params = init_params(k_p, Dn, De, Dm)

    new_nf, _, _ = graph_convolution(node_features, edge_indices,
                                     edge_features, params)
    new_nf = jax.block_until_ready(new_nf)

    ref = reference(node_features, edge_indices, edge_features, params)
    max_err = float(jnp.max(jnp.abs(new_nf - ref)))
    # bf16 MXU operands (f32 accumulation) -> relaxed tolerance vs the f32 ref.
    assert jnp.allclose(new_nf, ref, atol=5e-2, rtol=5e-2), \
        f"mismatch vs reference (max abs err {max_err})"

    print("KERNEL_OK")
</pallas_src>

<mosaic_0001>
module attributes {stable_mosaic.version = 11 : i64} {
  func.func @gconv_kernel(%arg0: i32, %arg1: memref<32x128xf32, #tpu.memory_space<vmem>>, %arg2: memref<256x128xbf16, #tpu.memory_space<vmem>>, %arg3: memref<256x1xi32, #tpu.memory_space<vmem>>, %arg4: memref<256x1xi32, #tpu.memory_space<vmem>>, %arg5: memref<1x256xi32, #tpu.memory_space<vmem>>, %arg6: memref<128x128xbf16, #tpu.memory_space<vmem>>, %arg7: memref<128x128xbf16, #tpu.memory_space<vmem>>, %arg8: memref<128x128xbf16, #tpu.memory_space<vmem>>, %arg9: memref<1x128xf32, #tpu.memory_space<vmem>>, %arg10: memref<1x128xf32, #tpu.memory_space<vmem>>, %arg11: memref<1x1xf32, #tpu.memory_space<smem>>, %arg12: memref<128x128xbf16, #tpu.memory_space<vmem>>, %arg13: memref<128x128xbf16, #tpu.memory_space<vmem>>, %arg14: memref<1x128xf32, #tpu.memory_space<vmem>>, %arg15: memref<32x128xf32, #tpu.memory_space<vmem>>, %arg16: memref<32x128xf32, #tpu.memory_space<vmem>>) attributes {dimension_semantics = [#tpu.dimension_semantics<arbitrary>], iteration_bounds = array<i64: 2>, scalar_prefetch = 0 : i64, scratch_operands = 1 : i64, tpu.core_type = #tpu.core_type<tc>, window_params = [{pipeline_mode = #tpu.pipeline_mode<synchronous>, transform_indices = @transform_0, window_bounds = array<i64: 32, 128>}, {transform_indices = @transform_1, window_bounds = array<i64: 256, 128>}, {transform_indices = @transform_2, window_bounds = array<i64: 256, 1>}, {transform_indices = @transform_3, window_bounds = array<i64: 256, 1>}, {transform_indices = @transform_4, window_bounds = array<i64: 1, 256>}, {pipeline_mode = #tpu.pipeline_mode<synchronous>, transform_indices = @transform_5, window_bounds = array<i64: 128, 128>}, {pipeline_mode = #tpu.pipeline_mode<synchronous>, transform_indices = @transform_6, window_bounds = array<i64: 128, 128>}, {pipeline_mode = #tpu.pipeline_mode<synchronous>, transform_indices = @transform_7, window_bounds = array<i64: 128, 128>}, {pipeline_mode = #tpu.pipeline_mode<synchronous>, transform_indices = @transform_8, window_bounds = array<i64: 1, 128>}, {pipeline_mode = #tpu.pipeline_mode<synchronous>, transform_indices = @transform_9, window_bounds = array<i64: 1, 128>}, {transform_indices = @transform_10, window_bounds = array<i64: 1, 1>}, {pipeline_mode = #tpu.pipeline_mode<synchronous>, transform_indices = @transform_11, window_bounds = array<i64: 128, 128>}, {pipeline_mode = #tpu.pipeline_mode<synchronous>, transform_indices = @transform_12, window_bounds = array<i64: 128, 128>}, {pipeline_mode = #tpu.pipeline_mode<synchronous>, transform_indices = @transform_13, window_bounds = array<i64: 1, 128>}, {pipeline_mode = #tpu.pipeline_mode<synchronous>, transform_indices = @transform_14, window_bounds = array<i64: 32, 128>}]} {
    %c0 = arith.constant 0 : index
    %c0_0 = arith.constant 0 : index
    %0 = vector.load %arg1[%c0, %c0_0] : memref<32x128xf32, #tpu.memory_space<vmem>>, vector<32x128xf32>
    %1 = arith.truncf %0 : vector<32x128xf32> to vector<32x128xbf16>
    %c0_i32 = arith.constant 0 : i32
    %2 = arith.cmpi eq, %arg0, %c0_i32 : i32
    %3 = arith.extui %2 : i1 to i32
    %c0_i32_1 = arith.constant 0 : i32
    %4 = arith.cmpi ne, %3, %c0_i32_1 : i32
    scf.if %4 {
      %cst_35 = arith.constant 0.000000e+00 : f32
      %76 = vector.broadcast %cst_35 : f32 to vector<32x128xf32>
      %c0_36 = arith.constant 0 : index
      %c0_37 = arith.constant 0 : index
      %77 = vector.load %arg16[%c0_36, %c0_37] : memref<32x128xf32, #tpu.memory_space<vmem>>, vector<32x128xf32>
      tpu.vector_store %arg16[%c0_36, %c0_37], %76 {strides = array<i32>} : memref<32x128xf32, #tpu.memory_space<vmem>>, vector<32x128xf32>,
      %c0_38 = arith.constant 0 : index
      %c0_39 = arith.constant 0 : index
      %78 = vector.load %arg12[%c0_38, %c0_39] : memref<128x128xbf16, #tpu.memory_space<vmem>>, vector<128x128xbf16>
      %cst_40 = arith.constant dense<0.000000e+00> : vector<32x128xf32>
      %79 = tpu.matmul %1, %78, %cst_40 {dimension_numbers = #tpu.dot_dimension_numbers<[1], [0], [0], [1], [0, 0, 1, 1], [], []>} : vector<32x128xbf16>, vector<128x128xbf16>, vector<32x128xf32> -> vector<32x128xf32>
      %80 = arith.addf %0, %79 : vector<32x128xf32>
      %c0_41 = arith.constant 0 : index
      %c0_42 = arith.constant 0 : index
      %81 = vector.load %arg14[%c0_41, %c0_42] : memref<1x128xf32, #tpu.memory_space<vmem>>, vector<1x128xf32>
      %82 = vector.broadcast %81 : vector<1x128xf32> to vector<32x128xf32>
      %83 = arith.addf %80, %82 : vector<32x128xf32>
      %c0_43 = arith.constant 0 : index
      %c0_44 = arith.constant 0 : index
      %84 = vector.load %arg15[%c0_43, %c0_44] : memref<32x128xf32, #tpu.memory_space<vmem>>, vector<32x128xf32>
      tpu.vector_store %arg15[%c0_43, %c0_44], %83 {strides = array<i32>} : memref<32x128xf32, #tpu.memory_space<vmem>>, vector<32x128xf32>,
    } else {
    }
    %5 = tpu.iota {dimensions = array<i32: 1>} : vector<256x32xi32>
    %c0_2 = arith.constant 0 : index
    %c0_3 = arith.constant 0 : index
    %6 = vector.load %arg3[%c0_2, %c0_3] : memref<256x1xi32, #tpu.memory_space<vmem>>, vector<256x1xi32>
    %7 = vector.broadcast %6 : vector<256x1xi32> to vector<256x32xi32>
    %8 = arith.cmpi eq, %5, %7 : vector<256x32xi32>
    %9 = arith.extui %8 : vector<256x32xi1> to vector<256x32xi32>
    %10 = arith.sitofp %9 : vector<256x32xi32> to vector<256x32xf32>
    %11 = arith.truncf %10 : vector<256x32xf32> to vector<256x32xbf16>
    %c0_4 = arith.constant 0 : index
    %c0_5 = arith.constant 0 : index
    %12 = vector.load %arg4[%c0_4, %c0_5] : memref<256x1xi32, #tpu.memory_space<vmem>>, vector<256x1xi32>
    %13 = vector.broadcast %12 : vector<256x1xi32> to vector<256x32xi32>
    %14 = arith.cmpi eq, %5, %13 : vector<256x32xi32>
    %15 = arith.extui %14 : vector<256x32xi1> to vector<256x32xi32>
    %16 = arith.sitofp %15 : vector<256x32xi32> to vector<256x32xf32>
    %17 = arith.truncf %16 : vector<256x32xf32> to vector<256x32xbf16>
    %cst = arith.constant dense<0.000000e+00> : vector<256x128xf32>
    %18 = tpu.matmul %11, %1, %cst {dimension_numbers = #tpu.dot_dimension_numbers<[1], [0], [0], [1], [0, 0, 1, 1], [], []>} : vector<256x32xbf16>, vector<32x128xbf16>, vector<256x128xf32> -> vector<256x128xf32>
    %19 = arith.truncf %18 : vector<256x128xf32> to vector<256x128xbf16>
    %cst_6 = arith.constant dense<0.000000e+00> : vector<256x128xf32>
    %20 = tpu.matmul %17, %1, %cst_6 {dimension_numbers = #tpu.dot_dimension_numbers<[1], [0], [0], [1], [0, 0, 1, 1], [], []>} : vector<256x32xbf16>, vector<32x128xbf16>, vector<256x128xf32> -> vector<256x128xf32>
    %21 = arith.truncf %20 : vector<256x128xf32> to vector<256x128xbf16>
    %c0_7 = arith.constant 0 : index
    %c0_8 = arith.constant 0 : index
    %22 = vector.load %arg2[%c0_7, %c0_8] : memref<256x128xbf16, #tpu.memory_space<vmem>>, vector<256x128xbf16>
    %c0_9 = arith.constant 0 : index
    %c0_10 = arith.constant 0 : index
    %23 = vector.load %arg6[%c0_9, %c0_10] : memref<128x128xbf16, #tpu.memory_space<vmem>>, vector<128x128xbf16>
    %cst_11 = arith.constant dense<0.000000e+00> : vector<256x128xf32>
    %24 = tpu.matmul %19, %23, %cst_11 {dimension_numbers = #tpu.dot_dimension_numbers<[1], [0], [0], [1], [0, 0, 1, 1], [], []>} : vector<256x128xbf16>, vector<128x128xbf16>, vector<256x128xf32> -> vector<256x128xf32>
    %c0_12 = arith.constant 0 : index
    %c0_13 = arith.constant 0 : index
    %25 = vector.load %arg7[%c0_12, %c0_13] : memref<128x128xbf16, #tpu.memory_space<vmem>>, vector<128x128xbf16>
    %cst_14 = arith.constant dense<0.000000e+00> : vector<256x128xf32>
    %26 = tpu.matmul %21, %25, %cst_14 {dimension_numbers = #tpu.dot_dimension_numbers<[1], [0], [0], [1], [0, 0, 1, 1], [], []>} : vector<256x128xbf16>, vector<128x128xbf16>, vector<256x128xf32> -> vector<256x128xf32>
    %27 = arith.addf %24, %26 : vector<256x128xf32>
    %c0_15 = arith.constant 0 : index
    %c0_16 = arith.constant 0 : index
    %28 = vector.load %arg8[%c0_15, %c0_16] : memref<128x128xbf16, #tpu.memory_space<vmem>>, vector<128x128xbf16>
    %cst_17 = arith.constant dense<0.000000e+00> : vector<256x128xf32>
    %29 = tpu.matmul %22, %28, %cst_17 {dimension_numbers = #tpu.dot_dimension_numbers<[1], [0], [0], [1], [0, 0, 1, 1], [], []>} : vector<256x128xbf16>, vector<128x128xbf16>, vector<256x128xf32> -> vector<256x128xf32>
    %30 = arith.addf %27, %29 : vector<256x128xf32>
    %c0_18 = arith.constant 0 : index
    %c0_19 = arith.constant 0 : index
    %31 = vector.load %arg9[%c0_18, %c0_19] : memref<1x128xf32, #tpu.memory_space<vmem>>, vector<1x128xf32>
    %32 = vector.broadcast %31 : vector<1x128xf32> to vector<256x128xf32>
    %33 = arith.addf %30, %32 : vector<256x128xf32>
    %cst_20 = arith.constant 0.000000e+00 : f32
    %34 = vector.broadcast %cst_20 : f32 to vector<256x128xf32>
    %35 = arith.maximumf %33, %34 : vector<256x128xf32>
    %c0_21 = arith.constant 0 : index
    %c0_22 = arith.constant 0 : index
    %36 = vector.load %arg10[%c0_21, %c0_22] : memref<1x128xf32, #tpu.memory_space<vmem>>, vector<1x128xf32>
    %37 = vector.broadcast %36 : vector<1x128xf32> to vector<256x128xf32>
    %38 = arith.mulf %35, %37 : vector<256x128xf32>
    %cst_23 = arith.constant dense<0.000000e+00> : vector<256xf32>
    %39 = vector.multi_reduction <add>, %38, %cst_23 [1] : vector<256x128xf32> to vector<256xf32>
    %40 = vector.shape_cast %39 : vector<256xf32> to vector<256x1xf32>
    %c0_24 = arith.constant 0 : index
    %c0_25 = arith.constant 0 : index
    %41 = memref.load %arg11[%c0_24, %c0_25] : memref<1x1xf32, #tpu.memory_space<smem>>
    %42 = vector.broadcast %41 : f32 to vector<256x1xf32>
    %43 = arith.addf %40, %42 : vector<256x1xf32>
    %44 = arith.negf %43 : vector<256x1xf32>
    %45 = math.exp %44 : vector<256x1xf32>
    %cst_26 = arith.constant 1.000000e+00 : f32
    %46 = vector.broadcast %cst_26 : f32 to vector<256x1xf32>
    %47 = arith.addf %46, %45 : vector<256x1xf32>
    %48 = arith.divf %46, %47 : vector<256x1xf32>
    %49 = vector.broadcast %48 : vector<256x1xf32> to vector<256x128xf32>
    %50 = arith.mulf %35, %49 : vector<256x128xf32>
    %c256_i32 = arith.constant 256 : i32
    %51 = arith.muli %arg0, %c256_i32 : i32
    %52 = tpu.iota {dimensions = array<i32: 0>} : vector<256x1xi32>
    %53 = vector.broadcast %51 : i32 to vector<256x1xi32>
    %54 = arith.addi %53, %52 : vector<256x1xi32>
    %c300_i32 = arith.constant 300 : i32
    %55 = vector.broadcast %c300_i32 : i32 to vector<256x1xi32>
    %56 = arith.cmpi slt, %54, %55 : vector<256x1xi32>
    %57 = arith.extui %56 : vector<256x1xi1> to vector<256x1xi32>
    %58 = arith.sitofp %57 : vector<256x1xi32> to vector<256x1xf32>
    %59 = vector.broadcast %58 : vector<256x1xf32> to vector<256x128xf32>
    %60 = arith.mulf %50, %59 : vector<256x128xf32>
    %61 = tpu.iota {dimensions = array<i32: 0>} : vector<32x256xi32>
    %c0_27 = arith.constant 0 : index
    %c0_28 = arith.constant 0 : index
    %62 = vector.load %arg5[%c0_27, %c0_28] : memref<1x256xi32, #tpu.memory_space<vmem>>, vector<1x256xi32>
    %63 = vector.broadcast %62 : vector<1x256xi32> to vector<32x256xi32>
    %64 = arith.cmpi eq, %61, %63 : vector<32x256xi32>
    %65 = arith.extui %64 : vector<32x256xi1> to vector<32x256xi32>
    %66 = arith.sitofp %65 : vector<32x256xi32> to vector<32x256xf32>
    %67 = arith.truncf %66 : vector<32x256xf32> to vector<32x256xbf16>
    %c0_29 = arith.constant 0 : index
    %c0_30 = arith.constant 0 : index
    %68 = vector.load %arg16[%c0_29, %c0_30] : memref<32x128xf32, #tpu.memory_space<vmem>>, vector<32x128xf32>
    %69 = arith.truncf %60 : vector<256x128xf32> to vector<256x128xbf16>
    %cst_31 = arith.constant dense<0.000000e+00> : vector<32x128xf32>
    %70 = tpu.matmul %67, %69, %cst_31 {dimension_numbers = #tpu.dot_dimension_numbers<[1], [0], [0], [1], [0, 0, 1, 1], [], []>} : vector<32x256xbf16>, vector<256x128xbf16>, vector<32x128xf32> -> vector<32x128xf32>
    %71 = arith.addf %68, %70 : vector<32x128xf32>
    %c0_32 = arith.constant 0 : index
    %c0_33 = arith.constant 0 : index
    %72 = vector.load %arg16[%c0_32, %c0_33] : memref<32x128xf32, #tpu.memory_space<vmem>>, vector<32x128xf32>
    tpu.vector_store %arg16[%c0_32, %c0_33], %71 {strides = array<i32>} : memref<32x128xf32, #tpu.memory_space<vmem>>, vector<32x128xf32>,
    %c1_i32 = arith.constant 1 : i32
    %73 = arith.cmpi eq, %arg0, %c1_i32 : i32
    %74 = arith.extui %73 : i1 to i32
    %c0_i32_34 = arith.constant 0 : i32
    %75 = arith.cmpi ne, %74, %c0_i32_34 : i32
    scf.if %75 {
      %c0_35 = arith.constant 0 : index
      %c0_36 = arith.constant 0 : index
      %76 = vector.load %arg15[%c0_35, %c0_36] : memref<32x128xf32, #tpu.memory_space<vmem>>, vector<32x128xf32>
      %c0_37 = arith.constant 0 : index
      %c0_38 = arith.constant 0 : index
      %77 = vector.load %arg16[%c0_37, %c0_38] : memref<32x128xf32, #tpu.memory_space<vmem>>, vector<32x128xf32>
      %78 = arith.truncf %77 : vector<32x128xf32> to vector<32x128xbf16>
      %c0_39 = arith.constant 0 : index
      %c0_40 = arith.constant 0 : index
      %79 = vector.load %arg13[%c0_39, %c0_40] : memref<128x128xbf16, #tpu.memory_space<vmem>>, vector<128x128xbf16>
      %cst_41 = arith.constant dense<0.000000e+00> : vector<32x128xf32>
      %80 = tpu.matmul %78, %79, %cst_41 {dimension_numbers = #tpu.dot_dimension_numbers<[1], [0], [0], [1], [0, 0, 1, 1], [], []>} : vector<32x128xbf16>, vector<128x128xbf16>, vector<32x128xf32> -> vector<32x128xf32>
      %81 = arith.addf %76, %80 : vector<32x128xf32>
      %c0_42 = arith.constant 0 : index
      %c0_43 = arith.constant 0 : index
      %82 = vector.load %arg15[%c0_42, %c0_43] : memref<32x128xf32, #tpu.memory_space<vmem>>, vector<32x128xf32>
      tpu.vector_store %arg15[%c0_42, %c0_43], %81 {strides = array<i32>} : memref<32x128xf32, #tpu.memory_space<vmem>>, vector<32x128xf32>,
    } else {
    }
    return
  }
  func.func @transform_0(%arg0: i32) -> (i32, i32) {
    %c0_i32 = arith.constant 0 : i32
    %c0_i32_0 = arith.constant 0 : i32
    %c0_i32_1 = arith.constant 0 : i32
    return %c0_i32, %c0_i32_0 : i32, i32
  }
  func.func @transform_1(%arg0: i32) -> (i32, i32) {
    %c0_i32 = arith.constant 0 : i32
    %c0_i32_0 = arith.constant 0 : i32
    return %arg0, %c0_i32 : i32, i32
  }
  func.func @transform_2(%arg0: i32) -> (i32, i32) {
    %c0_i32 = arith.constant 0 : i32
    %c0_i32_0 = arith.constant 0 : i32
    return %arg0, %c0_i32 : i32, i32
  }
  func.func @transform_3(%arg0: i32) -> (i32, i32) {
    %c0_i32 = arith.constant 0 : i32
    %c0_i32_0 = arith.constant 0 : i32
    return %arg0, %c0_i32 : i32, i32
  }
  func.func @transform_4(%arg0: i32) -> (i32, i32) {
    %c0_i32 = arith.constant 0 : i32
    %c0_i32_0 = arith.constant 0 : i32
    return %c0_i32, %arg0 : i32, i32
  }
  func.func @transform_5(%arg0: i32) -> (i32, i32) {
    %c0_i32 = arith.constant 0 : i32
    %c0_i32_0 = arith.constant 0 : i32
    %c0_i32_1 = arith.constant 0 : i32
    return %c0_i32, %c0_i32_0 : i32, i32
  }
  func.func @transform_6(%arg0: i32) -> (i32, i32) {
    %c0_i32 = arith.constant 0 : i32
    %c0_i32_0 = arith.constant 0 : i32
    %c0_i32_1 = arith.constant 0 : i32
    return %c0_i32, %c0_i32_0 : i32, i32
  }
  func.func @transform_7(%arg0: i32) -> (i32, i32) {
    %c0_i32 = arith.constant 0 : i32
    %c0_i32_0 = arith.constant 0 : i32
    %c0_i32_1 = arith.constant 0 : i32
    return %c0_i32, %c0_i32_0 : i32, i32
  }
  func.func @transform_8(%arg0: i32) -> (i32, i32) {
    %c0_i32 = arith.constant 0 : i32
    %c0_i32_0 = arith.constant 0 : i32
    %c0_i32_1 = arith.constant 0 : i32
    return %c0_i32, %c0_i32_0 : i32, i32
  }
  func.func @transform_9(%arg0: i32) -> (i32, i32) {
    %c0_i32 = arith.constant 0 : i32
    %c0_i32_0 = arith.constant 0 : i32
    %c0_i32_1 = arith.constant 0 : i32
    return %c0_i32, %c0_i32_0 : i32, i32
  }
  func.func @transform_10(%arg0: i32) -> (i32, i32) {
    %c0_i32 = arith.constant 0 : i32
    %c0_i32_0 = arith.constant 0 : i32
    %c0_i32_1 = arith.constant 0 : i32
    return %c0_i32, %c0_i32_0 : i32, i32
  }
  func.func @transform_11(%arg0: i32) -> (i32, i32) {
    %c0_i32 = arith.constant 0 : i32
    %c0_i32_0 = arith.constant 0 : i32
    %c0_i32_1 = arith.constant 0 : i32
    return %c0_i32, %c0_i32_0 : i32, i32
  }
  func.func @transform_12(%arg0: i32) -> (i32, i32) {
    %c0_i32 = arith.constant 0 : i32
    %c0_i32_0 = arith.constant 0 : i32
    %c0_i32_1 = arith.constant 0 : i32
    return %c0_i32, %c0_i32_0 : i32, i32
  }
  func.func @transform_13(%arg0: i32) -> (i32, i32) {
    %c0_i32 = arith.constant 0 : i32
    %c0_i32_0 = arith.constant 0 : i32
    %c0_i32_1 = arith.constant 0 : i32
    return %c0_i32, %c0_i32_0 : i32, i32
  }
  func.func @transform_14(%arg0: i32) -> (i32, i32) {
    %c0_i32 = arith.constant 0 : i32
    %c0_i32_0 = arith.constant 0 : i32
    %c0_i32_1 = arith.constant 0 : i32
    return %c0_i32, %c0_i32_0 : i32, i32
  }
}

</mosaic_0001>

<bundles_post_ra>
// kernel: tpu_custom_call.1
= control target key start
LH: loop header
LB: loop body
LE: loop exit
PB: predicated region body
PF: predicated region fallthrough
CT: control target
= control target key end

     0   :  { %s5543_s0 = inlined_call_operand.vmem [shape: f32[32,128], index: 0, kind: input, shape index: {}]   ;;  %s5544_s1 = inlined_call_operand.vmem [shape: bf16[512,128], index: 1, kind: input, shape index: {}]   ;;  %s5545_s2 = inlined_call_operand.vmem [shape: s32[512,1], index: 2, kind: input, shape index: {}]   ;;  %s5546_s3 = inlined_call_operand.vmem [shape: s32[512,1], index: 3, kind: input, shape index: {}]   ;;  %s5547_s4 = inlined_call_operand.vmem [shape: s32[1,512], index: 4, kind: input, shape index: {}]   ;;  %s5548_s5 = inlined_call_operand.vmem [shape: bf16[128,128], index: 5, kind: input, shape index: {}]   ;;  %s5549_s6 = inlined_call_operand.vmem [shape: bf16[128,128], index: 6, kind: input, shape index: {}]   ;;  %s5550_s7 = inlined_call_operand.vmem [shape: bf16[128,128], index: 7, kind: input, shape index: {}]   ;;  %s5551_s8 = inlined_call_operand.vmem [shape: f32[1,128], index: 8, kind: input, shape index: {}]   ;;  %s5552_s9 = inlined_call_operand.vmem [shape: f32[1,128], index: 9, kind: input, shape index: {}]   ;;  %s5553_s10 = inlined_call_operand.<no memory space> [shape: f32[1,1], index: 10, kind: input, shape index: {}]   ;;  %s5554_s11 = inlined_call_operand.vmem [shape: bf16[128,128], index: 11, kind: input, shape index: {}]   ;;  %s5555_s12 = inlined_call_operand.vmem [shape: bf16[128,128], index: 12, kind: input, shape index: {}]   ;;  %s5556_s13 = inlined_call_operand.vmem [shape: f32[1,128], index: 13, kind: input, shape index: {}]   ;;  %s5557_s14 = inlined_call_operand.hbm [shape: f32[32,128], index: 14, kind: output, shape index: {}]  }
   0x1   :  { %5619 = sst [smem:[#allocation41_spill]] %s5543_s0 }
   0x2   :  { %19 = sst [smem:[#allocation3]] %s5553_s10 }
   0x3   :  { %20 = vsyncpa [#allocation5], 0  ;;  %s4455_s15 = smov 0  }
   0x4 LB: > { %s4461_s16 = sadd.s32 4294967295, %s4368_s15   ;;  %p3395_p0 = scmp.ge.s32.totalorder %s4368_s15, 1  ;;  %s4368_s15 = sphi %s4455_s15, %s26_s15  }
   0x5   : > { %p442_p1 = scmp.lt.s32.totalorder %s4368_s15, 3 }
   0x7   : > { %p443_p2 = pnand %p3395_p0, %p442_p1 }
   0x9   : > { %446 = sbr.rel (%p443_p2) target bundleno = 1650 (0x672), region = 76 }
  0x10   : > { %s3396_s10 = sshll.u32 %s4461_s16, 5  ;;  %s3402_s17 = sshll.u32 %s4461_s16, 1 }
  0x11   : > { %s5620_s0 = sld [smem:[#allocation41_spill]]  ;;  %p498_p3 = scmp.lt.s32.totalorder %s3396_s10, 63 }
  0x12   : > { %p516_p4 = scmp.lt.s32.totalorder %s3402_s17, 3  ;;  %p3403_p5 = scmp.ne.s32.totalorder %s4461_s16, 0 }
  0x13   : > { %s5724_s10 = smov (!%p498_p3, %s3396_s10), 63  ;;  %v4146_v6 = vld [vmem:[%s5554_s11] sm:$0xff] (!%p3403_p5)   ;;  %v4370_v7 = vmov (!%p3403_p5), 0.0   ;;  %v4147_v8 = vld [vmem:[%s5554_s11 + $0x8] sm:$0xff] (!%p3403_p5)   ;;  %v4148_v9 = vld [vmem:[%s5554_s11 + $0x10] sm:$0xff] (!%p3403_p5)  }
  0x14   : > { %s5726_s17 = smov (!%p516_p4, %s3402_s17), 3  ;;  %s3397_s26 = sshll.u32 %s5724_s10, 2  ;;  %531 = vst [vmem:[#allocation2] sm:$0xff] (!%p3403_p5), %v4370_v7  ;;  %532 = vst [vmem:[#allocation2 + $0x8] sm:$0xff] (!%p3403_p5), %v4370_v7  ;;  %3801 = vmatprep.subr.bf16.mxu0 (!%p3403_p5), %v4146_v6  ;;  %v4149_v10 = vld [vmem:[%s5554_s11 + $0x18] sm:$0xff] (!%p3403_p5)   ;;  %v4150_v11 = vld [vmem:[%s5554_s11 + $0x20] sm:$0xff] (!%p3403_p5)  }
  0x15   : > { %s3399_s27 = sshll.u32 %s5724_s10, 3  ;;  %s4488_s30 = scalar_lea.vmem %s5544_s1, %s3397_s26  ;;  %533 = vst [vmem:[#allocation2 + $0x10] sm:$0xff] (!%p3403_p5), %v4370_v7  ;;  %534 = vst [vmem:[#allocation2 + $0x18] sm:$0xff] (!%p3403_p5), %v4370_v7  ;;  %3802 = vmatpush3.bf16.msra.mxu0 (!%p3403_p5), %v4146_v6  ;;  %v4151_v12 = vld [vmem:[%s5554_s11 + $0x28] sm:$0xff] (!%p3403_p5)   ;;  %v4152_v13 = vld [vmem:[%s5554_s11 + $0x30] sm:$0xff] (!%p3403_p5)  }
  0x16   : > { %s4493_s20 = scalar_lea.vmem %s5545_s2, %s3399_s27  ;;  %s4498_s23 = scalar_lea.vmem %s5546_s3, %s3399_s27  ;;  %3803 = vmatprep.subr.bf16.mxu0 (!%p3403_p5), %v4147_v8  ;;  %v4153_v14 = vld [vmem:[%s5554_s11 + $0x38] sm:$0xff] (!%p3403_p5)   ;;  %v3412_v16 = vld [vmem:[%s5556_s13] ss:$0 sm:$0xff] (!%p3403_p5) }
  0x17   : > { %v521_v0 = vld [vmem:[%s5620_s0] sm:$0xff]  ;;  %v522_v1 = vld [vmem:[%s5620_s0 + $0x8] sm:$0xff]  ;;  %v523_v2 = vld [vmem:[%s5620_s0 + $0x10] sm:$0xff]  ;;  %530 = sbr.rel (%p3403_p5) target bundleno = 272 (0x110), region = 80 }
  0x18   : > { %v524_v3 = vld [vmem:[%s5620_s0 + $0x18] sm:$0xff]  ;;  %v4479_v4 = vpack.c.bf16 %v522_v1, %v521_v0  ;;  %s518_s0 = scalar_lea.vmem %s5547_s4, %s5726_s17 }
  0x19   : > { %v4481_v5 = vpack.c.bf16 %v524_v3, %v523_v2  ;;  %3804 = vmatpush3.bf16.msra.mxu0 (!%p3403_p5), %v4147_v8 }
  0x1a   : > { %3817 = vmatprep.mubr.bf16.mxu0 (!%p3403_p5), %v4479_v4  ;;  %3805 = vmatprep.subr.bf16.mxu0 (!%p3403_p5), %v4148_v9 }
  0x1d   : > { %3806 = vmatpush3.bf16.msra.mxu0 (!%p3403_p5), %v4148_v9 }
  0x1e   : > { %3807 = vmatprep.subr.bf16.mxu0 %v4149_v10 }
  0x21   : > { %3808 = vmatpush3.bf16.msra.mxu0 %v4149_v10 }
  0x22   : > { %3809 = vmatprep.subr.bf16.mxu0 %v4150_v11 }
  0x25   : > { %3810 = vmatpush3.bf16.msra.mxu0 %v4150_v11 }
  0x26   : > { %3811 = vmatprep.subr.bf16.mxu0 %v4151_v12 }
  0x29   : > { %3812 = vmatpush3.bf16.msra.mxu0 %v4151_v12 }
  0x2a   : > { %3813 = vmatprep.subr.bf16.mxu0 %v4152_v13 }
  0x2d   : > { %3814 = vmatpush3.bf16.msra.mxu0 %v4152_v13 }
  0x2e   : > { %3815 = vmatprep.subr.bf16.mxu0 %v4153_v14 }
  0x31   : > { %3816 = vmatpush3.bf16.msra.mxu0 %v4153_v14 }
  0x34   : > { %3818 = vmatmul.mubr.bf16.vlgmr.msra.gmra.mrb[0].mxu0 %v4481_v5 }
 0x107   : > { %v3819_v15 = vpop.f32.mrb[0].mxu0 }
 0x108   : > { %v650_v17 = vadd.f32 %v3819_v15, %v523_v2  ;;  %v633_v18 = vpop.f32.mrb[1].mxu0 }
 0x109   : > { %v648_v19 = vadd.f32 %v633_v18, %v521_v0  ;;  %v3820_v20 = vpop.f32.mrb[2].mxu0 }
 0x10a   : > { %v661_v21 = vadd.f32 %v3412_v16, %v650_v17  ;;  %v651_v22 = vadd.f32 %v3820_v20, %v524_v3  ;;  %v636_v23 = vpop.f32.mrb[3].mxu0 }
 0x10b   : > { %v659_v24 = vadd.f32 %v3412_v16, %v648_v19  ;;  %v649_v25 = vadd.f32 %v636_v23, %v522_v1 }
 0x10c   : > { %665 = vst [vmem:[#allocation4 + $0x10] sm:$0xff] %v661_v21  ;;  %v662_v26 = vadd.f32 %v3412_v16, %v651_v22 }
 0x10d   : > { %663 = vst [vmem:[#allocation4] sm:$0xff] %v659_v24  ;;  %v660_v27 = vadd.f32 %v3412_v16, %v649_v25 }
 0x10e   : > { %666 = vst [vmem:[#allocation4 + $0x18] sm:$0xff] %v662_v26 }
 0x10f   : > { %664 = vst [vmem:[#allocation4 + $0x8] sm:$0xff] %v660_v27 }
 0x110 PF: > { %v671_v28 = vld [vmem:[%s4493_s20 + $0x10] sm:$0xff]  ;;  %v669_v29 = vld [vmem:[%s4493_s20] sm:$0xff]  ;;  %3821 = vmatprep.subr.bf16.mxu0 %v4479_v4  ;;  %4057 = vmatprep.subr.bf16.mxu1 %v4479_v4  ;;  %v4371_v30 = vmov 0   ;;  %v672_v31 = vld [vmem:[%s4493_s20 + $0x18] sm:$0xff]  ;;  %vm1149_vm4 = vcmask 261120   ;;  %s2609_s21 = sld [smem:[#allocation3]] }
 0x111   : > { %4155 = vset.pattern.permute.xlu1 %v4371_v30  ;;  %4154 = vset.pattern.permute.xlu0 %v4371_v30  ;;  %v670_v32 = vld [vmem:[%s4493_s20 + $0x8] sm:$0xff]  ;;  %v673_v34 = vld [vmem:[%s4493_s20 + $0x20] sm:$0xff]  ;;  %v676_v35 = vld [vmem:[%s4493_s20 + $0x38] sm:$0xff]  ;;  %s3583_s17 = sshll.u32 %s4461_s16, 8  ;;  %p3632_p6 = scmp.ne.s32.totalorder %s4461_s16, 1 }
 0x112   : > { %708 = vperm.xlu1 %4155, %v671_v28   ;;  %702 = vperm.xlu0 %4154, %v669_v29   ;;  %v674_v33 = vld [vmem:[%s4493_s20 + $0x28] sm:$0xff]  ;;  %v675_v36 = vld [vmem:[%s4493_s20 + $0x30] sm:$0xff]  ;;  %v677_v38 = vld [vmem:[%s4493_s20 + $0x40] sm:$0xff] }
 0x113   : > { %3822 = vmatpush3.bf16.msra.mxu0 %v4479_v4  ;;  %4059 = vmatpush3.bf16.msra.mxu1 %v4479_v4  ;;  %v678_v37 = vld [vmem:[%s4493_s20 + $0x48] sm:$0xff]  ;;  %v680_v39 = vld [vmem:[%s4493_s20 + $0x58] sm:$0xff]  ;;  %v679_v40 = vld [vmem:[%s4493_s20 + $0x50] sm:$0xff] }
 0x114   : > { %3823 = vmatprep.subr.bf16.mxu0 %v4481_v5  ;;  %4058 = vmatprep.subr.bf16.mxu1 %v4481_v5  ;;  %v682_v41 = vld [vmem:[%s4493_s20 + $0x68] sm:$0xff]  ;;  %v681_v42 = vld [vmem:[%s4493_s20 + $0x60] sm:$0xff]  ;;  %v684_v43 = vld [vmem:[%s4493_s20 + $0x78] sm:$0xff] }
 0x115   : > { %v683_v44 = vld [vmem:[%s4493_s20 + $0x70] sm:$0xff]  ;;  %v686_v45 = vld [vmem:[%s4493_s20 + $0x88] sm:$0xff]  ;;  %v685_v46 = vld [vmem:[%s4493_s20 + $0x80] sm:$0xff] }
 0x116   : > { %711 = vperm.xlu1 %4155, %v672_v31   ;;  %705 = vperm.xlu0 %4154, %v670_v32   ;;  %v688_v47 = vld [vmem:[%s4493_s20 + $0x98] sm:$0xff]  ;;  %v687_v48 = vld [vmem:[%s4493_s20 + $0x90] sm:$0xff]  ;;  %v690_v49 = vld [vmem:[%s4493_s20 + $0xa8] sm:$0xff]  ;;  %v667_v31 = vlaneseq }
 0x117   : > { %3824 = vmatpush3.bf16.msra.mxu0 %v4481_v5  ;;  %4060 = vmatpush3.bf16.msra.mxu1 %v4481_v5  ;;  %v689_v50 = vld [vmem:[%s4493_s20 + $0xa0] sm:$0xff]  ;;  %v692_v51 = vld [vmem:[%s4493_s20 + $0xb8] sm:$0xff]  ;;  %v691_v52 = vld [vmem:[%s4493_s20 + $0xb0] sm:$0xff] }
 0x118   : > { %3857 = vmatprep.subr.bf16.mxu1 %v4479_v4  ;;  %v694_v53 = vld [vmem:[%s4493_s20 + $0xc8] sm:$0xff]  ;;  %v693_v54 = vld [vmem:[%s4493_s20 + $0xc0] sm:$0xff]  ;;  %v696_v55 = vld [vmem:[%s4493_s20 + $0xd8] sm:$0xff]  ;;  %v4608_v32 = vand.u32 127, %v667_v31 }
 0x119   : > { %v695_v56 = vld [vmem:[%s4493_s20 + $0xd0] sm:$0xff]  ;;  %v698_v57 = vld [vmem:[%s4493_s20 + $0xe8] sm:$0xff]  ;;  %v697_v58 = vld [vmem:[%s4493_s20 + $0xe0] sm:$0xff] }
 0x11a   : > { %717 = vperm.xlu1 %4155, %v674_v33   ;;  %714 = vperm.xlu0 %4154, %v673_v34   ;;  %v700_v59 = vld [vmem:[%s4493_s20 + $0xf8] sm:$0xff]  ;;  %v699_v60 = vld [vmem:[%s4493_s20 + $0xf0] sm:$0xff]  ;;  %v910_v61 = vld [vmem:[%s4498_s23 + $0x8] sm:$0xff] }
 0x11b   : > { %v909_v62 = vld [vmem:[%s4498_s23] sm:$0xff]  ;;  %v912_v63 = vld [vmem:[%s4498_s23 + $0x18] sm:$0xff]  ;;  %v911_v0 = vld [vmem:[%s4498_s23 + $0x10] sm:$0xff] }
 0x11c   : > { %v914_v1 = vld [vmem:[%s4498_s23 + $0x28] sm:$0xff]  ;;  %v913_v2 = vld [vmem:[%s4498_s23 + $0x20] sm:$0xff]  ;;  %v916_v3 = vld [vmem:[%s4498_s23 + $0x38] sm:$0xff] }
 0x11d   : > { %v915_v6 = vld [vmem:[%s4498_s23 + $0x30] sm:$0xff]  ;;  %v918_v7 = vld [vmem:[%s4498_s23 + $0x48] sm:$0xff]  ;;  %v917_v8 = vld [vmem:[%s4498_s23 + $0x40] sm:$0xff] }
 0x11e   : > { %723 = vperm.xlu1 %4155, %v676_v35   ;;  %720 = vperm.xlu0 %4154, %v675_v36   ;;  %v920_v9 = vld [vmem:[%s4498_s23 + $0x58] sm:$0xff]  ;;  %v919_v10 = vld [vmem:[%s4498_s23 + $0x50] sm:$0xff]  ;;  %v922_v11 = vld [vmem:[%s4498_s23 + $0x68] sm:$0xff] }
 0x11f   : > { %v921_v12 = vld [vmem:[%s4498_s23 + $0x60] sm:$0xff]  ;;  %v924_v13 = vld [vmem:[%s4498_s23 + $0x78] sm:$0xff]  ;;  %v923_v14 = vld [vmem:[%s4498_s23 + $0x70] sm:$0xff] }
 0x120   : > { %v926_v15 = vld [vmem:[%s4498_s23 + $0x88] sm:$0xff]  ;;  %v925_v16 = vld [vmem:[%s4498_s23 + $0x80] sm:$0xff]  ;;  %v928_v17 = vld [vmem:[%s4498_s23 + $0x98] sm:$0xff] }
 0x121   : > { %v927_v18 = vld [vmem:[%s4498_s23 + $0x90] sm:$0xff]  ;;  %v930_v19 = vld [vmem:[%s4498_s23 + $0xa8] sm:$0xff]  ;;  %v929_v20 = vld [vmem:[%s4498_s23 + $0xa0] sm:$0xff] }
 0x122   : > { %729 = vperm.xlu1 %4155, %v678_v37   ;;  %726 = vperm.xlu0 %4154, %v677_v38   ;;  %v932_v21 = vld [vmem:[%s4498_s23 + $0xb8] sm:$0xff]  ;;  %v931_v22 = vld [vmem:[%s4498_s23 + $0xb0] sm:$0xff]  ;;  %v934_v23 = vld [vmem:[%s4498_s23 + $0xc8] sm:$0xff]  ;;  %v5592_v38 = vmov 0.0  }
 0x123   : > { %v933_v24 = vld [vmem:[%s4498_s23 + $0xc0] sm:$0xff]  ;;  %v936_v25 = vld [vmem:[%s4498_s23 + $0xd8] sm:$0xff]  ;;  %v935_v26 = vld [vmem:[%s4498_s23 + $0xd0] sm:$0xff] }
 0x124   : > { %v938_v27 = vld [vmem:[%s4498_s23 + $0xe8] sm:$0xff]  ;;  %v937_v28 = vld [vmem:[%s4498_s23 + $0xe0] sm:$0xff]  ;;  %v940_v29 = vld [vmem:[%s4498_s23 + $0xf8] sm:$0xff] }
 0x125   : > { %v939_v30 = vld [vmem:[%s4498_s23 + $0xf0] sm:$0xff]  ;;  %v4156_v35 = vld [vmem:[%s5548_s5] sm:$0xff]  }
 0x126   : > { %735 = vperm.xlu1 %4155, %v680_v39   ;;  %732 = vperm.xlu0 %4154, %v679_v40  }
 0x127   : > { %3941 = vmatprep.subr.bf16.mxu0 %v4156_v35 }
 0x12a   : > { %741 = vperm.xlu1 %4155, %v682_v41   ;;  %738 = vperm.xlu0 %4154, %v681_v42  }
 0x12e   : > { %747 = vperm.xlu1 %4155, %v684_v43   ;;  %744 = vperm.xlu0 %4154, %v683_v44  }
 0x132   : > { %753 = vperm.xlu1 %4155, %v686_v45   ;;  %750 = vperm.xlu0 %4154, %v685_v46  }
 0x136   : > { %759 = vperm.xlu1 %4155, %v688_v47   ;;  %756 = vperm.xlu0 %4154, %v687_v48   ;;  %v4157_v47 = vld [vmem:[%s5548_s5 + $0x8] sm:$0xff]  }
 0x13a   : > { %765 = vperm.xlu1 %4155, %v690_v49   ;;  %762 = vperm.xlu0 %4154, %v689_v50  }
 0x13e   : > { %771 = vperm.xlu1 %4155, %v692_v51   ;;  %768 = vperm.xlu0 %4154, %v691_v52  }
 0x142   : > { %777 = vperm.xlu1 %4155, %v694_v53   ;;  %774 = vperm.xlu0 %4154, %v693_v54   ;;  %v4158_v53 = vld [vmem:[%s5548_s5 + $0x10] sm:$0xff]  }
 0x146   : > { %783 = vperm.xlu1 %4155, %v696_v55   ;;  %780 = vperm.xlu0 %4154, %v695_v56  }
 0x14a   : > { %789 = vperm.xlu1 %4155, %v698_v57   ;;  %786 = vperm.xlu0 %4154, %v697_v58  }
 0x14e   : > { %795 = vperm.xlu1 %4155, %v700_v59   ;;  %792 = vperm.xlu0 %4154, %v699_v60   ;;  %v4159_v59 = vld [vmem:[%s5548_s5 + $0x18] sm:$0xff]  }
 0x152   : > { %945 = vperm.xlu1 %4155, %v910_v61   ;;  %942 = vperm.xlu0 %4154, %v909_v62  }
 0x156   : > { %951 = vperm.xlu1 %4155, %v912_v63   ;;  %948 = vperm.xlu0 %4154, %v911_v0  }
 0x15a   : > { %957 = vperm.xlu1 %4155, %v914_v1   ;;  %954 = vperm.xlu0 %4154, %v913_v2   ;;  %v4160_v1 = vld [vmem:[%s5548_s5 + $0x20] sm:$0xff]  }
 0x15e   : > { %963 = vperm.xlu1 %4155, %v916_v3   ;;  %960 = vperm.xlu0 %4154, %v915_v6  }
 0x162   : > { %969 = vperm.xlu1 %4155, %v918_v7   ;;  %966 = vperm.xlu0 %4154, %v917_v8  }
 0x166   : > { %975 = vperm.xlu1 %4155, %v920_v9   ;;  %972 = vperm.xlu0 %4154, %v919_v10   ;;  %v4161_v9 = vld [vmem:[%s5548_s5 + $0x28] sm:$0xff]  }
 0x16a   : > { %981 = vperm.xlu1 %4155, %v922_v11   ;;  %978 = vperm.xlu0 %4154, %v921_v12  }
 0x16e   : > { %987 = vperm.xlu1 %4155, %v924_v13   ;;  %984 = vperm.xlu0 %4154, %v923_v14  }
 0x172   : > { %993 = vperm.xlu1 %4155, %v926_v15   ;;  %990 = vperm.xlu0 %4154, %v925_v16   ;;  %v4162_v15 = vld [vmem:[%s5548_s5 + $0x30] sm:$0xff]  }
 0x176   : > { %999 = vperm.xlu1 %4155, %v928_v17   ;;  %996 = vperm.xlu0 %4154, %v927_v18  }
 0x17a   : > { %1005 = vperm.xlu1 %4155, %v930_v19   ;;  %1002 = vperm.xlu0 %4154, %v929_v20  }
 0x17e   : > { %1011 = vperm.xlu1 %4155, %v932_v21   ;;  %1008 = vperm.xlu0 %4154, %v931_v22  }
 0x182   : > { %1017 = vperm.xlu1 %4155, %v934_v23   ;;  %1014 = vperm.xlu0 %4154, %v933_v24  }
 0x186   : > { %1023 = vperm.xlu1 %4155, %v936_v25   ;;  %1020 = vperm.xlu0 %4154, %v935_v26  }
 0x18a   : > { %1029 = vperm.xlu1 %4155, %v938_v27   ;;  %1026 = vperm.xlu0 %4154, %v937_v28  }
 0x18e   : > { %1035 = vperm.xlu1 %4155, %v940_v29   ;;  %1032 = vperm.xlu0 %4154, %v939_v30  }
 0x191   : > { %v709_v33 = vpop.permute.xlu1 %708  ;;  %v703_v34 = vpop.permute.xlu0 %702 }
 0x192   : > { %vm799_vm0 = vcmp.eq.s32.totalorder %v4608_v32, %v709_v33  ;;  %vm797_vm1 = vcmp.eq.s32.totalorder %v4608_v32, %v703_v34 }
 0x193   : > { %v3415_v39 = vsel %vm799_vm0, 1.0, %v5592_v38  ;;  %v3413_v40 = vsel %vm797_vm1, 1.0, %v5592_v38 }
 0x195   : > { %v712_v36 = vpop.permute.xlu1 %711  ;;  %v706_v37 = vpop.permute.xlu0 %705 }
 0x196   : > { %vm800_vm2 = vcmp.eq.s32.totalorder %v4608_v32, %v712_v36  ;;  %vm798_vm3 = vcmp.eq.s32.totalorder %v4608_v32, %v706_v37 }
 0x197   : > { %v3416_v41 = vsel %vm800_vm2, 1.0, %v5592_v38  ;;  %v3414_v42 = vsel %vm798_vm3, 1.0, %v5592_v38 }
 0x198   : > { %v894_v43 = vpack.c.bf16 %v3416_v41, %v3415_v39  ;;  %v893_v44 = vpack.c.bf16 %v3414_v42, %v3413_v40 }
 0x199   : > { %v718_v45 = vpop.permute.xlu1 %717  ;;  %v715_v46 = vpop.permute.xlu0 %714 }
 0x19a   : > { %vm802_vm5 = vcmp.eq.s32.totalorder %v4608_v32, %v718_v45  ;;  %vm801_vm6 = vcmp.eq.s32.totalorder %v4608_v32, %v715_v46  ;;  %3825 = vmatprep.mubr.msk.bf16.mxu0 %vm1149_vm4, %v893_v44 }
 0x19b   : > { %v3418_v48 = vsel %vm802_vm5, 1.0, %v5592_v38  ;;  %v3417_v49 = vsel %vm801_vm6, 1.0, %v5592_v38  ;;  %3826 = vmatmul.mubr.msk.bf16.vlgmr.msra.gmra.mrb[0].mxu0 %vm1149_vm4, %v894_v43 }
 0x19c   : > { %v895_v50 = vpack.c.bf16 %v3418_v48, %v3417_v49  ;;  %3942 = vmatpush3.bf16.msra.mxu0 %v4156_v35 }
 0x19d   : > { %v724_v51 = vpop.permute.xlu1 %723  ;;  %v721_v52 = vpop.permute.xlu0 %720  ;;  %3943 = vmatprep.subr.bf16.mxu0 %v4157_v47 }
 0x19e   : > { %vm804_vm7 = vcmp.eq.s32.totalorder %v4608_v32, %v724_v51  ;;  %vm803_vm8 = vcmp.eq.s32.totalorder %v4608_v32, %v721_v52  ;;  %3829 = vmatprep.mubr.msk.bf16.mxu0 %vm1149_vm4, %v895_v50 }
 0x19f   : > { %v3420_v54 = vsel %vm804_vm7, 1.0, %v5592_v38  ;;  %v3419_v55 = vsel %vm803_vm8, 1.0, %v5592_v38 }
 0x1a0   : > { %v896_v56 = vpack.c.bf16 %v3420_v54, %v3419_v55  ;;  %3944 = vmatpush3.bf16.msra.mxu0 %v4157_v47 }
 0x1a1   : > { %v730_v57 = vpop.permute.xlu1 %729  ;;  %v727_v58 = vpop.permute.xlu0 %726  ;;  %3945 = vmatprep.subr.bf16.mxu0 %v4158_v53 }
 0x1a2   : > { %vm806_vm9 = vcmp.eq.s32.totalorder %v4608_v32, %v730_v57  ;;  %vm805_vm10 = vcmp.eq.s32.totalorder %v4608_v32, %v727_v58 }
 0x1a3   : > { %v3422_v60 = vsel %vm806_vm9, 1.0, %v5592_v38  ;;  %v3421_v61 = vsel %vm805_vm10, 1.0, %v5592_v38  ;;  %3830 = vmatmul.mubr.msk.bf16.gmra.mrb[4].mxu0 %vm1149_vm4, %v896_v56 }
 0x1a4   : > { %v897_v62 = vpack.c.bf16 %v3422_v60, %v3421_v61  ;;  %3946 = vmatpush3.bf16.msra.mxu0 %v4158_v53 }
 0x1a5   : > { %v736_v63 = vpop.permute.xlu1 %735  ;;  %v733_v0 = vpop.permute.xlu0 %732  ;;  %3947 = vmatprep.subr.bf16.mxu0 %v4159_v59 }
 0x1a6   : > { %vm808_vm11 = vcmp.eq.s32.totalorder %v4608_v32, %v736_v63  ;;  %vm807_vm12 = vcmp.eq.s32.totalorder %v4608_v32, %v733_v0  ;;  %3833 = vmatprep.mubr.msk.bf16.mxu0 %vm1149_vm4, %v897_v62 }
 0x1a7   : > { %v3424_v2 = vsel %vm808_vm11, 1.0, %v5592_v38  ;;  %v3423_v3 = vsel %vm807_vm12, 1.0, %v5592_v38 }
 0x1a8   : > { %v898_v6 = vpack.c.bf16 %v3424_v2, %v3423_v3  ;;  %3948 = vmatpush3.bf16.msra.mxu0 %v4159_v59 }
 0x1a9   : > { %v742_v7 = vpop.permute.xlu1 %741  ;;  %v739_v8 = vpop.permute.xlu0 %738  ;;  %3949 = vmatprep.subr.bf16.mxu0 %v4160_v1 }
 0x1aa   : > { %vm810_vm13 = vcmp.eq.s32.totalorder %v4608_v32, %v742_v7  ;;  %vm809_vm14 = vcmp.eq.s32.totalorder %v4608_v32, %v739_v8 }
 0x1ab   : > { %v3426_v10 = vsel %vm810_vm13, 1.0, %v5592_v38  ;;  %v3425_v11 = vsel %vm809_vm14, 1.0, %v5592_v38  ;;  %3834 = vmatmul.mubr.msk.bf16.gmra.mrb[8].mxu0 %vm1149_vm4, %v898_v6 }
 0x1ac   : > { %v899_v12 = vpack.c.bf16 %v3426_v10, %v3425_v11  ;;  %3950 = vmatpush3.bf16.msra.mxu0 %v4160_v1 }
 0x1ad   : > { %v748_v13 = vpop.permute.xlu1 %747  ;;  %v745_v14 = vpop.permute.xlu0 %744  ;;  %3951 = vmatprep.subr.bf16.mxu0 %v4161_v9 }
 0x1ae   : > { %vm812_vm15 = vcmp.eq.s32.totalorder %v4608_v32, %v748_v13  ;;  %vm811_vm0 = vcmp.eq.s32.totalorder %v4608_v32, %v745_v14  ;;  %3837 = vmatprep.mubr.msk.bf16.mxu0 %vm1149_vm4, %v899_v12 }
 0x1af   : > { %v3428_v16 = vsel %vm812_vm15, 1.0, %v5592_v38  ;;  %v3427_v17 = vsel %vm811_vm0, 1.0, %v5592_v38 }
 0x1b0   : > { %v900_v18 = vpack.c.bf16 %v3428_v16, %v3427_v17  ;;  %3952 = vmatpush3.bf16.msra.mxu0 %v4161_v9 }
 0x1b1   : > { %v754_v19 = vpop.permute.xlu1 %753  ;;  %v751_v20 = vpop.permute.xlu0 %750  ;;  %3953 = vmatprep.subr.bf16.mxu0 %v4162_v15 }
 0x1b2   : > { %vm814_vm1 = vcmp.eq.s32.totalorder %v4608_v32, %v754_v19  ;;  %vm813_vm2 = vcmp.eq.s32.totalorder %v4608_v32, %v751_v20 }
 0x1b3   : > { %v3430_v21 = vsel %vm814_vm1, 1.0, %v5592_v38  ;;  %v3429_v22 = vsel %vm813_vm2, 1.0, %v5592_v38  ;;  %3838 = vmatmul.mubr.msk.bf16.gmra.mrb[12].mxu0 %vm1149_vm4, %v900_v18 }
 0x1b4   : > { %v901_v23 = vpack.c.bf16 %v3430_v21, %v3429_v22  ;;  %3954 = vmatpush3.bf16.msra.mxu0 %v4162_v15 }
 0x1b5   : > { %v760_v24 = vpop.permute.xlu1 %759  ;;  %v757_v25 = vpop.permute.xlu0 %756 }
 0x1b6   : > { %vm816_vm3 = vcmp.eq.s32.totalorder %v4608_v32, %v760_v24  ;;  %vm815_vm5 = vcmp.eq.s32.totalorder %v4608_v32, %v757_v25  ;;  %3841 = vmatprep.mubr.msk.bf16.mxu0 %vm1149_vm4, %v901_v23 }
 0x1b7   : > { %v3432_v26 = vsel %vm816_vm3, 1.0, %v5592_v38  ;;  %v3431_v27 = vsel %vm815_vm5, 1.0, %v5592_v38 }
 0x1b8   : > { %v902_v28 = vpack.c.bf16 %v3432_v26, %v3431_v27 }
 0x1b9   : > { %v766_v29 = vpop.permute.xlu1 %765  ;;  %v763_v30 = vpop.permute.xlu0 %762 }
 0x1ba   : > { %vm818_vm6 = vcmp.eq.s32.totalorder %v4608_v32, %v766_v29  ;;  %vm817_vm7 = vcmp.eq.s32.totalorder %v4608_v32, %v763_v30 }
 0x1bb   : > { %v3434_v33 = vsel %vm818_vm6, 1.0, %v5592_v38  ;;  %v3433_v34 = vsel %vm817_vm7, 1.0, %v5592_v38  ;;  %3842 = vmatmul.mubr.msk.bf16.gmra.mrb[16].mxu0 %vm1149_vm4, %v902_v28 }
 0x1bc   : > { %v903_v35 = vpack.c.bf16 %v3434_v33, %v3433_v34 }
 0x1bd   : > { %v772_v36 = vpop.permute.xlu1 %771  ;;  %v769_v37 = vpop.permute.xlu0 %768 }
 0x1be   : > { %vm820_vm8 = vcmp.eq.s32.totalorder %v4608_v32, %v772_v36  ;;  %vm819_vm9 = vcmp.eq.s32.totalorder %v4608_v32, %v769_v37  ;;  %3845 = vmatprep.mubr.msk.bf16.mxu1 %vm1149_vm4, %v903_v35 }
 0x1bf   : > { %v3436_v39 = vsel %vm820_vm8, 1.0, %v5592_v38  ;;  %v3435_v40 = vsel %vm819_vm9, 1.0, %v5592_v38 }
 0x1c0   : > { %v904_v41 = vpack.c.bf16 %v3436_v39, %v3435_v40  ;;  %v4163_v40 = vld [vmem:[%s5548_s5 + $0x38] sm:$0xff]  }
 0x1c1   : > { %v778_v42 = vpop.permute.xlu1 %777  ;;  %v775_v43 = vpop.permute.xlu0 %774  ;;  %3955 = vmatprep.subr.bf16.mxu0 %v4163_v40 }
 0x1c2   : > { %vm822_vm10 = vcmp.eq.s32.totalorder %v4608_v32, %v778_v42  ;;  %vm821_vm11 = vcmp.eq.s32.totalorder %v4608_v32, %v775_v43  ;;  %3846 = vmatmul.mubr.msk.bf16.vlgmr.msra.gmra.mrb[0].mxu1 %vm1149_vm4, %v904_v41  ;;  %3956 = vmatpush3.bf16.msra.mxu0 %v4163_v40 }
 0x1c3   : > { %v3438_v44 = vsel %vm822_vm10, 1.0, %v5592_v38  ;;  %v3437_v45 = vsel %vm821_vm11, 1.0, %v5592_v38  ;;  %3858 = vmatpush3.bf16.msra.mxu1 %v4479_v4 }
 0x1c4   : > { %v905_v46 = vpack.c.bf16 %v3438_v44, %v3437_v45  ;;  %3859 = vmatprep.subr.bf16.mxu1 %v4481_v5 }
 0x1c5   : > { %v784_v47 = vpop.permute.xlu1 %783  ;;  %v781_v48 = vpop.permute.xlu0 %780 }
 0x1c6   : > { %vm824_vm12 = vcmp.eq.s32.totalorder %v4608_v32, %v784_v47  ;;  %vm823_vm13 = vcmp.eq.s32.totalorder %v4608_v32, %v781_v48  ;;  %3849 = vmatprep.mubr.msk.bf16.mxu1 %vm1149_vm4, %v905_v46 }
 0x1c7   : > { %v3440_v49 = vsel %vm824_vm12, 1.0, %v5592_v38  ;;  %v3439_v50 = vsel %vm823_vm13, 1.0, %v5592_v38  ;;  %3860 = vmatpush3.bf16.msra.mxu1 %v4481_v5 }
 0x1c8   : > { %v906_v51 = vpack.c.bf16 %v3440_v49, %v3439_v50 }
 0x1c9   : > { %v790_v52 = vpop.permute.xlu1 %789  ;;  %v787_v4 = vpop.permute.xlu0 %786 }
 0x1ca   : > { %vm826_vm14 = vcmp.eq.s32.totalorder %v4608_v32, %v790_v52  ;;  %vm825_vm15 = vcmp.eq.s32.totalorder %v4608_v32, %v787_v4  ;;  %3850 = vmatmul.mubr.msk.bf16.gmra.mrb[4].mxu1 %vm1149_vm4, %v906_v51 }
 0x1cb   : > { %v3442_v53 = vsel %vm826_vm14, 1.0, %v5592_v38  ;;  %v3441_v54 = vsel %vm825_vm15, 1.0, %v5592_v38 }
 0x1cc   : > { %v907_v55 = vpack.c.bf16 %v3442_v53, %v3441_v54 }
 0x1cd   : > { %v796_v56 = vpop.permute.xlu1 %795  ;;  %v793_v57 = vpop.permute.xlu0 %792 }
 0x1ce   : > { %vm828_vm0 = vcmp.eq.s32.totalorder %v4608_v32, %v796_v56  ;;  %vm827_vm1 = vcmp.eq.s32.totalorder %v4608_v32, %v793_v57  ;;  %3853 = vmatprep.mubr.msk.bf16.mxu1 %vm1149_vm4, %v907_v55 }
 0x1cf   : > { %v3444_v5 = vsel %vm828_vm0, 1.0, %v5592_v38  ;;  %v3443_v58 = vsel %vm827_vm1, 1.0, %v5592_v38 }
 0x1d0   : > { %v908_v59 = vpack.c.bf16 %v3444_v5, %v3443_v58 }
 0x1d1   : > { %v946_v60 = vpop.permute.xlu1 %945  ;;  %v943_v61 = vpop.permute.xlu0 %942 }
 0x1d2   : > { %vm1038_vm2 = vcmp.eq.s32.totalorder %v4608_v32, %v946_v60  ;;  %vm1037_vm3 = vcmp.eq.s32.totalorder %v4608_v32, %v943_v61  ;;  %3854 = vmatmul.mubr.msk.bf16.gmra.mrb[8].mxu1 %vm1149_vm4, %v908_v59 }
 0x1d3   : > { %v3446_v62 = vsel %vm1038_vm2, 1.0, %v5592_v38  ;;  %v3445_v63 = vsel %vm1037_vm3, 1.0, %v5592_v38 }
 0x1d4   : > { %v1133_v0 = vpack.c.bf16 %v3446_v62, %v3445_v63 }
 0x1d5   : > { %v952_v1 = vpop.permute.xlu1 %951  ;;  %v949_v2 = vpop.permute.xlu0 %948 }
 0x1d6   : > { %vm1040_vm5 = vcmp.eq.s32.totalorder %v4608_v32, %v952_v1  ;;  %vm1039_vm6 = vcmp.eq.s32.totalorder %v4608_v32, %v949_v2  ;;  %3861 = vmatprep.mubr.msk.bf16.mxu1 %vm1149_vm4, %v1133_v0 }
 0x1d7   : > { %v3448_v3 = vsel %vm1040_vm5, 1.0, %v5592_v38  ;;  %v3447_v6 = vsel %vm1039_vm6, 1.0, %v5592_v38 }
 0x1d8   : > { %v1134_v7 = vpack.c.bf16 %v3448_v3, %v3447_v6 }
 0x1d9   : > { %v958_v8 = vpop.permute.xlu1 %957  ;;  %v955_v9 = vpop.permute.xlu0 %954 }
 0x1da   : > { %vm1042_vm7 = vcmp.eq.s32.totalorder %v4608_v32, %v958_v8  ;;  %vm1041_vm8 = vcmp.eq.s32.totalorder %v4608_v32, %v955_v9  ;;  %3862 = vmatmul.mubr.msk.bf16.vlgmr.msra.gmra.mrb[12].mxu1 %vm1149_vm4, %v1134_v7 }
 0x1db   : > { %v3450_v10 = vsel %vm1042_vm7, 1.0, %v5592_v38  ;;  %v3449_v11 = vsel %vm1041_vm8, 1.0, %v5592_v38 }
 0x1dc   : > { %v1135_v12 = vpack.c.bf16 %v3450_v10, %v3449_v11 }
 0x1dd   : > { %v964_v13 = vpop.permute.xlu1 %963  ;;  %v961_v14 = vpop.permute.xlu0 %960 }
 0x1de   : > { %vm1044_vm9 = vcmp.eq.s32.totalorder %v4608_v32, %v964_v13  ;;  %vm1043_vm10 = vcmp.eq.s32.totalorder %v4608_v32, %v961_v14  ;;  %3865 = vmatprep.mubr.msk.bf16.mxu1 %vm1149_vm4, %v1135_v12 }
 0x1df   : > { %v3452_v15 = vsel %vm1044_vm9, 1.0, %v5592_v38  ;;  %v3451_v16 = vsel %vm1043_vm10, 1.0, %v5592_v38 }
 0x1e0   : > { %v1136_v17 = vpack.c.bf16 %v3452_v15, %v3451_v16 }
 0x1e1   : > { %v970_v18 = vpop.permute.xlu1 %969  ;;  %v967_v19 = vpop.permute.xlu0 %966 }
 0x1e2   : > { %vm1046_vm11 = vcmp.eq.s32.totalorder %v4608_v32, %v970_v18  ;;  %vm1045_vm12 = vcmp.eq.s32.totalorder %v4608_v32, %v967_v19  ;;  %3866 = vmatmul.mubr.msk.bf16.gmra.mrb[16].mxu1 %vm1149_vm4, %v1136_v17  ;;  %v4164_v18 = vld [vmem:[%s5549_s6] sm:$0xff]  }
 0x1e3   : > { %v3454_v20 = vsel %vm1046_vm11, 1.0, %v5592_v38  ;;  %v3453_v21 = vsel %vm1045_vm12, 1.0, %v5592_v38  ;;  %v4165_v19 = vld [vmem:[%s5550_s7] sm:$0xff]   ;;  %3893 = vmatprep.subr.bf16.mxu1 %v4164_v18 }
 0x1e4   : > { %v1137_v22 = vpack.c.bf16 %v3454_v20, %v3453_v21  ;;  %3989 = vmatprep.subr.bf16.mxu0 %v4165_v19  ;;  %3894 = vmatpush3.bf16.msra.mxu1 %v4164_v18  ;;  %v4168_v20 = vld [vmem:[%s5549_s6 + $0x10] sm:$0xff]   ;;  %v4170_v21 = vld [vmem:[%s5549_s6 + $0x18] sm:$0xff]  }
 0x1e5   : > { %v976_v23 = vpop.permute.xlu1 %975  ;;  %v973_v24 = vpop.permute.xlu0 %972 }
 0x1e6   : > { %vm1048_vm13 = vcmp.eq.s32.totalorder %v4608_v32, %v976_v23  ;;  %vm1047_vm14 = vcmp.eq.s32.totalorder %v4608_v32, %v973_v24  ;;  %3869 = vmatprep.mubr.msk.bf16.mxu1 %vm1149_vm4, %v1137_v22  ;;  %v4172_v22 = vld [vmem:[%s5549_s6 + $0x20] sm:$0xff]   ;;  %v4174_v23 = vld [vmem:[%s5549_s6 + $0x28] sm:$0xff]   ;;  %v4176_v24 = vld [vmem:[%s5549_s6 + $0x30] sm:$0xff]  }
 0x1e7   : > { %v3456_v25 = vsel %vm1048_vm13, 1.0, %v5592_v38  ;;  %v3455_v26 = vsel %vm1047_vm14, 1.0, %v5592_v38 }
 0x1e8   : > { %v1138_v27 = vpack.c.bf16 %v3456_v25, %v3455_v26  ;;  %v4178_v25 = vld [vmem:[%s5549_s6 + $0x38] sm:$0xff]  }
 0x1e9   : > { %v982_v28 = vpop.permute.xlu1 %981  ;;  %v979_v29 = vpop.permute.xlu0 %978 }
 0x1ea   : > { %vm1050_vm15 = vcmp.eq.s32.totalorder %v4608_v32, %v982_v28  ;;  %vm1049_vm0 = vcmp.eq.s32.totalorder %v4608_v32, %v979_v29  ;;  %3870 = vmatmul.mubr.msk.bf16.gmra.mrb[20].mxu1 %vm1149_vm4, %v1138_v27 }
 0x1eb   : > { %v3458_v30 = vsel %vm1050_vm15, 1.0, %v5592_v38  ;;  %v3457_v33 = vsel %vm1049_vm0, 1.0, %v5592_v38 }
 0x1ec   : > { %v1139_v34 = vpack.c.bf16 %v3458_v30, %v3457_v33 }
 0x1ed   : > { %v988_v35 = vpop.permute.xlu1 %987  ;;  %v985_v36 = vpop.permute.xlu0 %984 }
 0x1ee   : > { %vm1052_vm1 = vcmp.eq.s32.totalorder %v4608_v32, %v988_v35  ;;  %vm1051_vm2 = vcmp.eq.s32.totalorder %v4608_v32, %v985_v36  ;;  %3873 = vmatprep.mubr.msk.bf16.mxu1 %vm1149_vm4, %v1139_v34  ;;  %v4167_v34 = vld [vmem:[%s5550_s7 + $0x8] sm:$0xff]  }
 0x1ef   : > { %v3460_v37 = vsel %vm1052_vm1, 1.0, %v5592_v38  ;;  %v3459_v39 = vsel %vm1051_vm2, 1.0, %v5592_v38 }
 0x1f0   : > { %v1140_v41 = vpack.c.bf16 %v3460_v37, %v3459_v39  ;;  %v4169_v37 = vld [vmem:[%s5550_s7 + $0x10] sm:$0xff]  }
 0x1f1   : > { %v994_v42 = vpop.permute.xlu1 %993  ;;  %v991_v43 = vpop.permute.xlu0 %990 }
 0x1f2   : > { %vm1054_vm3 = vcmp.eq.s32.totalorder %v4608_v32, %v994_v42  ;;  %vm1053_vm5 = vcmp.eq.s32.totalorder %v4608_v32, %v991_v43  ;;  %3874 = vmatmul.mubr.msk.bf16.gmra.mrb[24].mxu1 %vm1149_vm4, %v1140_v41  ;;  %v4171_v43 = vld [vmem:[%s5550_s7 + $0x18] sm:$0xff]  }
 0x1f3   : > { %v3462_v44 = vsel %vm1054_vm3, 1.0, %v5592_v38  ;;  %v3461_v45 = vsel %vm1053_vm5, 1.0, %v5592_v38 }
 0x1f4   : > { %v1141_v46 = vpack.c.bf16 %v3462_v44, %v3461_v45 }
 0x1f5   : > { %v1000_v47 = vpop.permute.xlu1 %999  ;;  %v997_v48 = vpop.permute.xlu0 %996 }
 0x1f6   : > { %vm1056_vm6 = vcmp.eq.s32.totalorder %v4608_v32, %v1000_v47  ;;  %vm1055_vm7 = vcmp.eq.s32.totalorder %v4608_v32, %v997_v48  ;;  %3877 = vmatprep.mubr.msk.bf16.mxu1 %vm1149_vm4, %v1141_v46  ;;  %v4173_v46 = vld [vmem:[%s5550_s7 + $0x20] sm:$0xff]  }
 0x1f7   : > { %v3464_v49 = vsel %vm1056_vm6, 1.0, %v5592_v38  ;;  %v3463_v50 = vsel %vm1055_vm7, 1.0, %v5592_v38 }
 0x1f8   : > { %v1142_v51 = vpack.c.bf16 %v3464_v49, %v3463_v50 }
 0x1f9   : > { %v1006_v52 = vpop.permute.xlu1 %1005  ;;  %v1003_v4 = vpop.permute.xlu0 %1002 }
 0x1fa   : > { %vm1058_vm8 = vcmp.eq.s32.totalorder %v4608_v32, %v1006_v52  ;;  %vm1057_vm9 = vcmp.eq.s32.totalorder %v4608_v32, %v1003_v4  ;;  %3878 = vmatmul.mubr.msk.bf16.gmra.mrb[28].mxu1 %vm1149_vm4, %v1142_v51  ;;  %v4175_v51 = vld [vmem:[%s5550_s7 + $0x28] sm:$0xff]  }
 0x1fb   : > { %v3466_v53 = vsel %vm1058_vm8, 1.0, %v5592_v38  ;;  %v3465_v54 = vsel %vm1057_vm9, 1.0, %v5592_v38 }
 0x1fc   : > { %v1143_v55 = vpack.c.bf16 %v3466_v53, %v3465_v54  ;;  %v4177_v53 = vld [vmem:[%s5550_s7 + $0x30] sm:$0xff]  }
 0x1fd   : > { %v1012_v56 = vpop.permute.xlu1 %1011  ;;  %v1009_v57 = vpop.permute.xlu0 %1008 }
 0x1fe   : > { %vm1060_vm10 = vcmp.eq.s32.totalorder %v4608_v32, %v1012_v56  ;;  %vm1059_vm11 = vcmp.eq.s32.totalorder %v4608_v32, %v1009_v57  ;;  %3881 = vmatprep.mubr.msk.bf16.mxu1 %vm1149_vm4, %v1143_v55 }
 0x1ff   : > { %v3468_v5 = vsel %vm1060_vm10, 1.0, %v5592_v38  ;;  %v3467_v58 = vsel %vm1059_vm11, 1.0, %v5592_v38 }
 0x200   : > { %v1144_v59 = vpack.c.bf16 %v3468_v5, %v3467_v58  ;;  %v4179_v5 = vld [vmem:[%s5550_s7 + $0x38] sm:$0xff]  }
 0x201   : > { %v1018_v60 = vpop.permute.xlu1 %1017  ;;  %v1015_v61 = vpop.permute.xlu0 %1014 }
 0x202   : > { %vm1062_vm12 = vcmp.eq.s32.totalorder %v4608_v32, %v1018_v60  ;;  %vm1061_vm13 = vcmp.eq.s32.totalorder %v4608_v32, %v1015_v61  ;;  %3882 = vmatmul.mubr.msk.bf16.gmra.mrb[32].mxu1 %vm1149_vm4, %v1144_v59 }
 0x203   : > { %v3470_v62 = vsel %vm1062_vm12, 1.0, %v5592_v38  ;;  %v3469_v63 = vsel %vm1061_vm13, 1.0, %v5592_v38 }
 0x204   : > { %v1145_v0 = vpack.c.bf16 %v3470_v62, %v3469_v63 }
 0x205   : > { %v1024_v1 = vpop.permute.xlu1 %1023  ;;  %v1021_v2 = vpop.permute.xlu0 %1020 }
 0x206   : > { %vm1064_vm14 = vcmp.eq.s32.totalorder %v4608_v32, %v1024_v1  ;;  %vm1063_vm15 = vcmp.eq.s32.totalorder %v4608_v32, %v1021_v2  ;;  %3885 = vmatprep.mubr.msk.bf16.mxu1 %vm1149_vm4, %v1145_v0 }
 0x207   : > { %v3472_v3 = vsel %vm1064_vm14, 1.0, %v5592_v38  ;;  %v3471_v6 = vsel %vm1063_vm15, 1.0, %v5592_v38 }
 0x208   : > { %v1146_v7 = vpack.c.bf16 %v3472_v3, %v3471_v6 }
 0x209   : > { %v1030_v8 = vpop.permute.xlu1 %1029  ;;  %v1027_v9 = vpop.permute.xlu0 %1026 }
 0x20a   : > { %vm1066_vm0 = vcmp.eq.s32.totalorder %v4608_v32, %v1030_v8  ;;  %vm1065_vm1 = vcmp.eq.s32.totalorder %v4608_v32, %v1027_v9  ;;  %3886 = vmatmul.mubr.msk.bf16.gmra.mrb[36].mxu1 %vm1149_vm4, %v1146_v7 }
 0x20b   : > { %v3474_v10 = vsel %vm1066_vm0, 1.0, %v5592_v38  ;;  %v3473_v11 = vsel %vm1065_vm1, 1.0, %v5592_v38 }
 0x20c   : > { %v1147_v12 = vpack.c.bf16 %v3474_v10, %v3473_v11 }
 0x20d   : > { %v1036_v13 = vpop.permute.xlu1 %1035  ;;  %v1033_v14 = vpop.permute.xlu0 %1032 }
 0x20e   : > { %vm1068_vm2 = vcmp.eq.s32.totalorder %v4608_v32, %v1036_v13  ;;  %vm1067_vm3 = vcmp.eq.s32.totalorder %v4608_v32, %v1033_v14  ;;  %3889 = vmatprep.mubr.msk.bf16.mxu1 %vm1149_vm4, %v1147_v12  ;;  %v4166_v32 = vld [vmem:[%s5549_s6 + $0x8] sm:$0xff]  }
 0x20f   : > { %v3476_v15 = vsel %vm1068_vm2, 1.0, %v5592_v38  ;;  %v3475_v16 = vsel %vm1067_vm3, 1.0, %v5592_v38  ;;  %3895 = vmatprep.subr.bf16.mxu1 %v4166_v32 }
 0x210   : > { %v1148_v17 = vpack.c.bf16 %v3476_v15, %v3475_v16  ;;  %3896 = vmatpush3.bf16.msra.mxu1 %v4166_v32  ;;  %v4180_v32 = vld [vmem:[%s4488_s30] sm:$0xff]  }
 0x211   : > { %3897 = vmatprep.subr.bf16.mxu1 %v4168_v20 }
 0x212   : > { %3890 = vmatmul.mubr.msk.bf16.gmra.mrb[40].mxu1 %vm1149_vm4, %v1148_v17 }
 0x214   : > { %3898 = vmatpush3.bf16.msra.mxu1 %v4168_v20 }
 0x215   : > { %3899 = vmatprep.subr.bf16.mxu1 %v4170_v21 }
 0x218   : > { %3900 = vmatpush3.bf16.msra.mxu1 %v4170_v21 }
 0x219   : > { %3901 = vmatprep.subr.bf16.mxu1 %v4172_v22 }
 0x21c   : > { %3902 = vmatpush3.bf16.msra.mxu1 %v4172_v22 }
 0x21d   : > { %3903 = vmatprep.subr.bf16.mxu1 %v4174_v23 }
 0x220   : > { %3904 = vmatpush3.bf16.msra.mxu1 %v4174_v23 }
 0x221   : > { %3905 = vmatprep.subr.bf16.mxu1 %v4176_v24 }
 0x224   : > { %3906 = vmatpush3.bf16.msra.mxu1 %v4176_v24 }
 0x225   : > { %3907 = vmatprep.subr.bf16.mxu1 %v4178_v25 }
 0x228   : > { %3908 = vmatpush3.bf16.msra.mxu1 %v4178_v25 }
 0x26e   : > { %v3827_v26 = vpop.f32.mrb[0].mxu0 }
 0x26f   : > { %v1232_v27 = vpop.f32.mrb[1].mxu0 }
 0x270   : > { %v3828_v28 = vpop.f32.mrb[2].mxu0 }
 0x271   : > { %v1360_v29 = vpack.c.bf16 %v3828_v28, %v3827_v26  ;;  %v1235_v30 = vpop.f32.mrb[3].mxu0  ;;  %v4181_v26 = vld [vmem:[%s4488_s30 + $0x8] sm:$0xff]  }
 0x272   : > { %v1359_v33 = vpack.c.bf16 %v1235_v30, %v1232_v27  ;;  %v4182_v27 = vld [vmem:[%s4488_s30 + $0x10] sm:$0xff]  }
 0x274   : > { %3957 = vmatprep.mubr.bf16.mxu0 %v1359_v33 }
 0x275   : > { %3958 = vmatmul.mubr.bf16.vlgmr.msra.gmra.mrb[20].mxu0 %v1360_v29 }
 0x276   : > { %v3831_v35 = vpop.f32.mrb[4].mxu0  ;;  %3990 = vmatpush3.bf16.msra.mxu0 %v4165_v19 }
 0x277   : > { %v1248_v36 = vpop.f32.mrb[5].mxu0  ;;  %3991 = vmatprep.subr.bf16.mxu0 %v4167_v34 }
 0x278   : > { %v3832_v39 = vpop.f32.mrb[6].mxu0 }
 0x279   : > { %v1362_v40 = vpack.c.bf16 %v3832_v39, %v3831_v35  ;;  %v1251_v41 = vpop.f32.mrb[7].mxu0 }
 0x27a   : > { %v1361_v42 = vpack.c.bf16 %v1251_v41, %v1248_v36  ;;  %3992 = vmatpush3.bf16.msra.mxu0 %v4167_v34  ;;  %v4183_v36 = vld [vmem:[%s4488_s30 + $0x18] sm:$0xff]  }
 0x27b   : > { %3993 = vmatprep.subr.bf16.mxu0 %v4169_v37 }
 0x27c   : > { %3961 = vmatprep.mubr.bf16.mxu0 %v1361_v42 }
 0x27d   : > { %3962 = vmatmul.mubr.bf16.gmra.mrb[24].mxu0 %v1362_v40 }
 0x27e   : > { %v3835_v44 = vpop.f32.mrb[8].mxu0  ;;  %3994 = vmatpush3.bf16.msra.mxu0 %v4169_v37  ;;  %v4184_v37 = vld [vmem:[%s4488_s30 + $0x20] sm:$0xff]  }
 0x27f   : > { %v1264_v45 = vpop.f32.mrb[9].mxu0  ;;  %3995 = vmatprep.subr.bf16.mxu0 %v4171_v43 }
 0x280   : > { %v3836_v47 = vpop.f32.mrb[10].mxu0 }
 0x281   : > { %v1364_v48 = vpack.c.bf16 %v3836_v47, %v3835_v44  ;;  %v1267_v49 = vpop.f32.mrb[11].mxu0 }
 0x282   : > { %v1363_v50 = vpack.c.bf16 %v1267_v49, %v1264_v45  ;;  %3996 = vmatpush3.bf16.msra.mxu0 %v4171_v43  ;;  %v4185_v45 = vld [vmem:[%s4488_s30 + $0x28] sm:$0xff]  }
 0x283   : > { %3997 = vmatprep.subr.bf16.mxu0 %v4173_v46 }
 0x284   : > { %3965 = vmatprep.mubr.bf16.mxu0 %v1363_v50 }
 0x285   : > { %3966 = vmatmul.mubr.bf16.gmra.mrb[28].mxu0 %v1364_v48 }
 0x286   : > { %v3839_v52 = vpop.f32.mrb[12].mxu0  ;;  %3998 = vmatpush3.bf16.msra.mxu0 %v4173_v46  ;;  %v4186_v46 = vld [vmem:[%s4488_s30 + $0x30] sm:$0xff]  }
 0x287   : > { %v1280_v4 = vpop.f32.mrb[13].mxu0  ;;  %3999 = vmatprep.subr.bf16.mxu0 %v4175_v51 }
 0x288   : > { %v3840_v54 = vpop.f32.mrb[14].mxu0 }
 0x289   : > { %v1366_v55 = vpack.c.bf16 %v3840_v54, %v3839_v52  ;;  %v1283_v56 = vpop.f32.mrb[15].mxu0 }
 0x28a   : > { %v1365_v57 = vpack.c.bf16 %v1283_v56, %v1280_v4  ;;  %4000 = vmatpush3.bf16.msra.mxu0 %v4175_v51  ;;  %v4187_v4 = vld [vmem:[%s4488_s30 + $0x38] sm:$0xff]  }
 0x28b   : > { %4001 = vmatprep.subr.bf16.mxu0 %v4177_v53 }
 0x28c   : > { %3969 = vmatprep.mubr.bf16.mxu0 %v1365_v57 }
 0x28d   : > { %3970 = vmatmul.mubr.bf16.gmra.mrb[32].mxu0 %v1366_v55 }
 0x28e   : > { %v3843_v58 = vpop.f32.mrb[16].mxu0  ;;  %4002 = vmatpush3.bf16.msra.mxu0 %v4177_v53  ;;  %v4188_v53 = vld [vmem:[%s4488_s30 + $0x40] sm:$0xff]  }
 0x28f   : > { %v1296_v59 = vpop.f32.mrb[17].mxu0  ;;  %4003 = vmatprep.subr.bf16.mxu0 %v4179_v5 }
 0x290   : > { %v3844_v60 = vpop.f32.mrb[18].mxu0 }
 0x291   : > { %v1368_v61 = vpack.c.bf16 %v3844_v60, %v3843_v58  ;;  %v1299_v62 = vpop.f32.mrb[19].mxu0  ;;  %v4190_v60 = vld [vmem:[%s4488_s30 + $0x50] sm:$0xff]  }
 0x292   : > { %v1367_v63 = vpack.c.bf16 %v1299_v62, %v1296_v59  ;;  %4004 = vmatpush3.bf16.msra.mxu0 %v4179_v5  ;;  %v4189_v59 = vld [vmem:[%s4488_s30 + $0x48] sm:$0xff]  }
 0x294   : > { %3973 = vmatprep.mubr.bf16.mxu0 %v1367_v63 }
 0x295   : > { %v3847_v0 = vpop.f32.mrb[0].mxu1  ;;  %3974 = vmatmul.mubr.bf16.gmra.mrb[36].mxu0 %v1368_v61 }
 0x296   : > { %v1312_v1 = vpop.f32.mrb[1].mxu1 }
 0x297   : > { %v3848_v2 = vpop.f32.mrb[2].mxu1 }
 0x298   : > { %v1370_v3 = vpack.c.bf16 %v3848_v2, %v3847_v0  ;;  %v1315_v6 = vpop.f32.mrb[3].mxu1 }
 0x299   : > { %v1369_v7 = vpack.c.bf16 %v1315_v6, %v1312_v1  ;;  %v4192_v6 = vld [vmem:[%s4488_s30 + $0x60] sm:$0xff]  }
 0x29b   : > { %3977 = vmatprep.mubr.bf16.mxu0 %v1369_v7 }
 0x29d   : > { %v3851_v8 = vpop.f32.mrb[4].mxu1  ;;  %3978 = vmatmul.mubr.bf16.gmra.mrb[40].mxu0 %v1370_v3  ;;  %v4191_v3 = vld [vmem:[%s4488_s30 + $0x58] sm:$0xff]  }
 0x29e   : > { %v1328_v9 = vpop.f32.mrb[5].mxu1 }
 0x29f   : > { %v3852_v10 = vpop.f32.mrb[6].mxu1 }
 0x2a0   : > { %v1372_v11 = vpack.c.bf16 %v3852_v10, %v3851_v8  ;;  %v1331_v12 = vpop.f32.mrb[7].mxu1 }
 0x2a1   : > { %v1371_v13 = vpack.c.bf16 %v1331_v12, %v1328_v9 }
 0x2a3   : > { %3981 = vmatprep.mubr.bf16.mxu0 %v1371_v13  ;;  %v4193_v13 = vld [vmem:[%s4488_s30 + $0x68] sm:$0xff]  }
 0x2a5   : > { %v3855_v14 = vpop.f32.mrb[8].mxu1  ;;  %3982 = vmatmul.mubr.bf16.gmra.mrb[44].mxu0 %v1372_v11 }
 0x2a6   : > { %v1344_v15 = vpop.f32.mrb[9].mxu1 }
 0x2a7   : > { %v3856_v16 = vpop.f32.mrb[10].mxu1 }
 0x2a8   : > { %v1374_v17 = vpack.c.bf16 %v3856_v16, %v3855_v14  ;;  %v1347_v18 = vpop.f32.mrb[11].mxu1  ;;  %v4194_v14 = vld [vmem:[%s4488_s30 + $0x70] sm:$0xff]  }
 0x2a9   : > { %v1373_v19 = vpack.c.bf16 %v1347_v18, %v1344_v15 }
 0x2ab   : > { %3985 = vmatprep.mubr.bf16.mxu0 %v1373_v19 }
 0x2ad   : > { %v3863_v20 = vpop.f32.mrb[12].mxu1  ;;  %3986 = vmatmul.mubr.bf16.gmra.mrb[48].mxu0 %v1374_v17 }
 0x2ae   : > { %v1457_v21 = vpop.f32.mrb[13].mxu1  ;;  %4005 = vmatprep.mubr.bf16.mxu0 %v4180_v32 }
 0x2af   : > { %v3864_v22 = vpop.f32.mrb[14].mxu1 }
 0x2b0   : > { %v1585_v23 = vpack.c.bf16 %v3864_v22, %v3863_v20  ;;  %v1460_v24 = vpop.f32.mrb[15].mxu1  ;;  %v4195_v20 = vld [vmem:[%s4488_s30 + $0x78] sm:$0xff]  }
 0x2b1   : > { %v1584_v25 = vpack.c.bf16 %v1460_v24, %v1457_v21  ;;  %v4864_v24 = vld [vmem:[%s5551_s8] ss:$0 sm:$0xff] }
 0x2b3   : > { %3909 = vmatprep.mubr.bf16.mxu1 %v1584_v25 }
 0x2b4   : > { %3910 = vmatmul.mubr.bf16.vlgmr.msra.gmra.mrb[44].mxu1 %v1585_v23 }
 0x2b5   : > { %v3867_v28 = vpop.f32.mrb[16].mxu1  ;;  %4006 = vmatmul.mubr.bf16.vlgmr.msra.gmra.mrb[20].mxu0 %v4181_v26 }
 0x2b6   : > { %v1473_v29 = vpop.f32.mrb[17].mxu1  ;;  %4009 = vmatprep.mubr.bf16.mxu0 %v4182_v27 }
 0x2b7   : > { %v3868_v30 = vpop.f32.mrb[18].mxu1 }
 0x2b8   : > { %v1587_v33 = vpack.c.bf16 %v3868_v30, %v3867_v28  ;;  %v1476_v34 = vpop.f32.mrb[19].mxu1 }
 0x2b9   : > { %v1586_v35 = vpack.c.bf16 %v1476_v34, %v1473_v29 }
 0x2bb   : > { %3913 = vmatprep.mubr.bf16.mxu1 %v1586_v35 }
 0x2bc   : > { %3914 = vmatmul.mubr.bf16.gmra.mrb[48].mxu1 %v1587_v33 }
 0x2bd   : > { %v3871_v39 = vpop.f32.mrb[20].mxu1  ;;  %4010 = vmatmul.mubr.bf16.gmra.mrb[24].mxu0 %v4183_v36 }
 0x2be   : > { %v1489_v40 = vpop.f32.mrb[21].mxu1  ;;  %4013 = vmatprep.mubr.bf16.mxu0 %v4184_v37 }
 0x2bf   : > { %v3872_v41 = vpop.f32.mrb[22].mxu1 }
 0x2c0   : > { %v1589_v42 = vpack.c.bf16 %v3872_v41, %v3871_v39  ;;  %v1492_v43 = vpop.f32.mrb[23].mxu1  ;;  %v4875_v39 = vld [vmem:[%s5552_s9] ss:$0 sm:$0xff] }
 0x2c1   : > { %v1588_v44 = vpack.c.bf16 %v1492_v43, %v1489_v40 }
 0x2c3   : > { %3917 = vmatprep.mubr.bf16.mxu1 %v1588_v44 }
 0x2c4   : > { %3918 = vmatmul.mubr.bf16.gmra.mrb[52].mxu1 %v1589_v42 }
 0x2c5   : > { %v3875_v47 = vpop.f32.mrb[24].mxu1  ;;  %4014 = vmatmul.mubr.bf16.gmra.mrb[28].mxu0 %v4185_v45 }
 0x2c6   : > { %v1505_v48 = vpop.f32.mrb[25].mxu1  ;;  %4017 = vmatprep.mubr.bf16.mxu0 %v4186_v46 }
 0x2c7   : > { %v3876_v49 = vpop.f32.mrb[26].mxu1 }
 0x2c8   : > { %v1591_v50 = vpack.c.bf16 %v3876_v49, %v3875_v47  ;;  %v1508_v51 = vpop.f32.mrb[27].mxu1 }
 0x2c9   : > { %v1590_v52 = vpack.c.bf16 %v1508_v51, %v1505_v48 }
 0x2cb   : > { %3921 = vmatprep.mubr.bf16.mxu1 %v1590_v52 }
 0x2cc   : > { %3922 = vmatmul.mubr.bf16.gmra.mrb[56].mxu1 %v1591_v50 }
 0x2cd   : > { %v3879_v54 = vpop.f32.mrb[28].mxu1  ;;  %4018 = vmatmul.mubr.bf16.gmra.mrb[32].mxu0 %v4187_v4 }
 0x2ce   : > { %v1521_v55 = vpop.f32.mrb[29].mxu1  ;;  %4021 = vmatprep.mubr.bf16.mxu0 %v4188_v53 }
 0x2cf   : > { %v3880_v56 = vpop.f32.mrb[30].mxu1 }
 0x2d0   : > { %v1593_v57 = vpack.c.bf16 %v3880_v56, %v3879_v54  ;;  %v1524_v5 = vpop.f32.mrb[31].mxu1 }
 0x2d1   : > { %v1592_v58 = vpack.c.bf16 %v1524_v5, %v1521_v55 }
 0x2d3   : > { %3925 = vmatprep.mubr.bf16.mxu1 %v1592_v58 }
 0x2d4   : > { %3926 = vmatmul.mubr.bf16.gmra.mrb[60].mxu1 %v1593_v57 }
 0x2d5   : > { %v3883_v61 = vpop.f32.mrb[32].mxu1  ;;  %4022 = vmatmul.mubr.bf16.gmra.mrb[36].mxu0 %v4189_v59 }
 0x2d6   : > { %v1537_v62 = vpop.f32.mrb[33].mxu1  ;;  %4025 = vmatprep.mubr.bf16.mxu0 %v4190_v60 }
 0x2d7   : > { %v3884_v63 = vpop.f32.mrb[34].mxu1 }
 0x2d8   : > { %v1595_v0 = vpack.c.bf16 %v3884_v63, %v3883_v61  ;;  %v1540_v1 = vpop.f32.mrb[35].mxu1 }
 0x2d9   : > { %v1594_v2 = vpack.c.bf16 %v1540_v1, %v1537_v62 }
 0x2db   : > { %3929 = vmatprep.mubr.bf16.mxu1 %v1594_v2 }
 0x2dc   : > { %3930 = vmatmul.mubr.bf16.gmra.mrb[64].mxu1 %v1595_v0 }
 0x2dd   : > { %v3887_v7 = vpop.f32.mrb[36].mxu1  ;;  %4026 = vmatmul.mubr.bf16.gmra.mrb[40].mxu0 %v4191_v3 }
 0x2de   : > { %v1553_v8 = vpop.f32.mrb[37].mxu1  ;;  %4029 = vmatprep.mubr.bf16.mxu0 %v4192_v6 }
 0x2df   : > { %v3888_v9 = vpop.f32.mrb[38].mxu1 }
 0x2e0   : > { %v1597_v10 = vpack.c.bf16 %v3888_v9, %v3887_v7  ;;  %v1556_v11 = vpop.f32.mrb[39].mxu1 }
 0x2e1   : > { %v1596_v12 = vpack.c.bf16 %v1556_v11, %v1553_v8 }
 0x2e3   : > { %3933 = vmatprep.mubr.bf16.mxu1 %v1596_v12 }
 0x2e4   : > { %3934 = vmatmul.mubr.bf16.gmra.mrb[68].mxu1 %v1597_v10 }
 0x2e5   : > { %v3891_v15 = vpop.f32.mrb[40].mxu1  ;;  %4030 = vmatmul.mubr.bf16.gmra.mrb[44].mxu0 %v4193_v13 }
 0x2e6   : > { %v1569_v16 = vpop.f32.mrb[41].mxu1  ;;  %4033 = vmatprep.mubr.bf16.mxu0 %v4194_v14 }
 0x2e7   : > { %v3892_v17 = vpop.f32.mrb[42].mxu1 }
 0x2e8   : > { %v1599_v18 = vpack.c.bf16 %v3892_v17, %v3891_v15  ;;  %v1572_v19 = vpop.f32.mrb[43].mxu1 }
 0x2e9   : > { %v1598_v32 = vpack.c.bf16 %v1572_v19, %v1569_v16 }
 0x2eb   : > { %3937 = vmatprep.mubr.bf16.mxu1 %v1598_v32 }
 0x2ec   : > { %3938 = vmatmul.mubr.bf16.gmra.mrb[72].mxu1 %v1599_v18 }
 0x2ed   : > { %4034 = vmatmul.mubr.bf16.gmra.mrb[48].mxu0 %v4195_v20 }
 0x387   : > { %v3911_v21 = vpop.f32.mrb[44].mxu1 }
 0x388   : > { %v1746_v22 = vpop.f32.mrb[45].mxu1  ;;  %v4007_v23 = vpop.f32.mrb[20].mxu0 }
 0x389   : > { %v4061_v25 = vadd.f32 %v4007_v23, %v3911_v21  ;;  %v3912_v26 = vpop.f32.mrb[46].mxu1  ;;  %v2276_v27 = vpop.f32.mrb[21].mxu0 }
 0x38a   : > { %v4062_v28 = vadd.f32 %v2276_v27, %v1746_v22  ;;  %v1749_v29 = vpop.f32.mrb[47].mxu1  ;;  %v4008_v30 = vpop.f32.mrb[22].mxu0 }
 0x38b   : > { %v4867_v33 = vadd.f32 %v4061_v25, %v4864_v24  ;;  %v4063_v34 = vadd.f32 %v4008_v30, %v3912_v26  ;;  %v2279_v35 = vpop.f32.mrb[23].mxu0 }
 0x38c   : > { %v4870_v36 = vadd.f32 %v4062_v28, %v4864_v24  ;;  %v4064_v37 = vadd.f32 %v2279_v35, %v1749_v29 }
 0x38d   : > { %v5587_v40 = vmax.f32 %v4867_v33, 0.0  ;;  %v4879_v41 = vadd.f32 %v4063_v34, %v4864_v24 }
 0x38e   : > { %v5591_v42 = vmax.f32 %v4870_v36, 0.0  ;;  %v4887_v46 = vadd.f32 %v4064_v37, %v4864_v24 }
 0x38f   : > { %v3915_v43 = vpop.f32.mrb[48].mxu1  ;;  %v2515_v44 = vmul.f32 %v4875_v39, %v5587_v40  ;;  %v5590_v45 = vmax.f32 %v4879_v41, 0.0 }
 0x390   : > { %v1762_v47 = vpop.f32.mrb[49].mxu1  ;;  %v4011_v48 = vpop.f32.mrb[24].mxu0  ;;  %v2513_v49 = vmul.f32 %v4875_v39, %v5591_v42  ;;  %v5589_v5 = vmax.f32 %v4887_v46, 0.0 }
 0x391   : > { %v4065_v50 = vadd.f32 %v4011_v48, %v3915_v43  ;;  %v3916_v51 = vpop.f32.mrb[50].mxu1  ;;  %2549 = vadd.xlane.f32.xlu1 %v2515_v44  ;;  %v2292_v52 = vpop.f32.mrb[25].mxu0  ;;  %v2516_v60 = vmul.f32 %v4875_v39, %v5590_v45 }
 0x392   : > { %v4066_v4 = vadd.f32 %v2292_v52, %v1762_v47  ;;  %v1765_v53 = vpop.f32.mrb[51].mxu1  ;;  %2545 = vadd.xlane.f32.xlu0 %v2513_v49  ;;  %v4012_v54 = vpop.f32.mrb[26].mxu0  ;;  %v2514_v8 = vmul.f32 %v4875_v39, %v5589_v5 }
 0x393   : > { %v4893_v55 = vadd.f32 %v4065_v50, %v4864_v24  ;;  %v4067_v56 = vadd.f32 %v4012_v54, %v3916_v51  ;;  %v2295_v57 = vpop.f32.mrb[27].mxu0 }
 0x394   : > { %v4897_v58 = vadd.f32 %v4066_v4, %v4864_v24  ;;  %v4068_v59 = vadd.f32 %v2295_v57, %v1765_v53 }
 0x395   : > { %v5563_v61 = vmax.f32 %v4893_v55, 0.0  ;;  %v4904_v62 = vadd.f32 %v4067_v56, %v4864_v24 }
 0x396   : > { %2551 = vadd.xlane.f32.xlu0 %v2516_v60  ;;  %v5580_v63 = vmax.f32 %v4897_v58, 0.0  ;;  %v4912_v3 = vadd.f32 %v4068_v59, %v4864_v24 }
 0x397   : > { %v3919_v0 = vpop.f32.mrb[52].mxu1  ;;  %v2519_v1 = vmul.f32 %v4875_v39, %v5563_v61  ;;  %v5564_v2 = vmax.f32 %v4904_v62, 0.0 }
 0x398   : > { %v1778_v6 = vpop.f32.mrb[53].mxu1  ;;  %v4015_v7 = vpop.f32.mrb[28].mxu0  ;;  %v2517_v18 = vmul.f32 %v4875_v39, %v5580_v63  ;;  %v5583_v19 = vmax.f32 %v4912_v3, 0.0 }
 0x399   : > { %v4069_v9 = vadd.f32 %v4015_v7, %v3919_v0  ;;  %v3920_v10 = vpop.f32.mrb[54].mxu1  ;;  %2557 = vadd.xlane.f32.xlu1 %v2519_v1  ;;  %v2308_v11 = vpop.f32.mrb[29].mxu0  ;;  %v2520_v21 = vmul.f32 %v4875_v39, %v5564_v2 }
 0x39a   : > { %v4070_v12 = vadd.f32 %v2308_v11, %v1778_v6  ;;  %v1781_v13 = vpop.f32.mrb[55].mxu1  ;;  %2547 = vadd.xlane.f32.xlu0 %v2514_v8  ;;  %v4016_v14 = vpop.f32.mrb[30].mxu0  ;;  %v2518_v35 = vmul.f32 %v4875_v39, %v5583_v19 }
 0x39b   : > { %v4918_v15 = vadd.f32 %v4069_v9, %v4864_v24  ;;  %v4071_v16 = vadd.f32 %v4016_v14, %v3920_v10  ;;  %v2311_v17 = vpop.f32.mrb[31].mxu0 }
 0x39c   : > { %v4925_v32 = vadd.f32 %v4070_v12, %v4864_v24  ;;  %v4072_v20 = vadd.f32 %v2311_v17, %v1781_v13 }
 0x39d   : > { %5621 = vst [vmem:[#allocation7_spill] sm:$0xff] %v4918_v15  ;;  %v5558_v22 = vmax.f32 %v4918_v15, 0.0  ;;  %v4932_v23 = vadd.f32 %v4071_v16, %v4864_v24  ;;  %2553 = vadd.xlane.f32.xlu1 %v2517_v18 }
 0x39e   : > { %5622 = vst [vmem:[#allocation8_spill] sm:$0xff] %v4925_v32  ;;  %2559 = vadd.xlane.f32.xlu0 %v2520_v21  ;;  %v5560_v25 = vmax.f32 %v4925_v32, 0.0  ;;  %v4940_v29 = vadd.f32 %v4072_v20, %v4864_v24 }
 0x39f   : > { %5623 = vst [vmem:[#allocation9_spill] sm:$0xff] %v4932_v23  ;;  %v3923_v26 = vpop.f32.mrb[56].mxu1  ;;  %v2523_v27 = vmul.f32 %v4875_v39, %v5558_v22  ;;  %v5559_v28 = vmax.f32 %v4932_v23, 0.0 }
 0x3a0   : > { %5624 = vst [vmem:[#allocation10_spill] sm:$0xff] %v4940_v29  ;;  %v1794_v30 = vpop.f32.mrb[57].mxu1  ;;  %v4019_v34 = vpop.f32.mrb[32].mxu0  ;;  %v2521_v4 = vmul.f32 %v4875_v39, %v5560_v25  ;;  %v5561_v53 = vmax.f32 %v4940_v29, 0.0 }
 0x3a1   : > { %v4073_v37 = vadd.f32 %v4019_v34, %v3923_v26  ;;  %v3924_v43 = vpop.f32.mrb[58].mxu1  ;;  %2565 = vadd.xlane.f32.xlu1 %v2523_v27  ;;  %v2324_v44 = vpop.f32.mrb[33].mxu0  ;;  %v2524_v56 = vmul.f32 %v4875_v39, %v5559_v28 }
 0x3a2   : > { %v4945_v47 = vadd.f32 %v2324_v44, %v1794_v30  ;;  %v1797_v48 = vpop.f32.mrb[59].mxu1  ;;  %2555 = vadd.xlane.f32.xlu0 %v2518_v35  ;;  %v4020_v49 = vpop.f32.mrb[34].mxu0  ;;  %v2522_v1 = vmul.f32 %v4875_v39, %v5561_v53 }
 0x3a3   : > { %v4948_v50 = vadd.f32 %v4073_v37, %v4864_v24  ;;  %v4075_v51 = vadd.f32 %v4020_v49, %v3924_v43  ;;  %v2327_v52 = vpop.f32.mrb[35].mxu0 }
 0x3a4   : > { %v4954_v54 = vadd.f32 %v2327_v52, %v1797_v48 }
 0x3a5   : > { %5625 = vst [vmem:[#allocation11_spill] sm:$0xff] %v4948_v50  ;;  %v4960_v57 = vadd.f32 %v4075_v51, %v4864_v24  ;;  %2561 = vadd.xlane.f32.xlu1 %v2521_v4 }
 0x3a6   : > { %2567 = vadd.xlane.f32.xlu0 %v2524_v56 }
 0x3a7   : > { %5626 = vst [vmem:[#allocation12_spill] sm:$0xff] %v4960_v57  ;;  %v3927_v59 = vpop.f32.mrb[60].mxu1 }
 0x3a8   : > { %v1810_v60 = vpop.f32.mrb[61].mxu1  ;;  %v4023_v0 = vpop.f32.mrb[36].mxu0 }
 0x3a9   : > { %v4077_v6 = vadd.f32 %v4023_v0, %v3927_v59  ;;  %v3928_v7 = vpop.f32.mrb[62].mxu1  ;;  %v2340_v8 = vpop.f32.mrb[37].mxu0 }
 0x3aa   : > { %v4078_v9 = vadd.f32 %v2340_v8, %v1810_v60  ;;  %v1813_v10 = vpop.f32.mrb[63].mxu1  ;;  %2563 = vadd.xlane.f32.xlu0 %v2522_v1  ;;  %v4024_v11 = vpop.f32.mrb[38].mxu0 }
 0x3ab   : > { %v4966_v12 = vadd.f32 %v4077_v6, %v4864_v24  ;;  %v4079_v13 = vadd.f32 %v4024_v11, %v3928_v7  ;;  %v2343_v14 = vpop.f32.mrb[39].mxu0 }
 0x3ac   : > { %v4969_v16 = vadd.f32 %v4078_v9, %v4864_v24  ;;  %v4080_v17 = vadd.f32 %v2343_v14, %v1813_v10 }
 0x3ad   : > { %v5588_v18 = vmax.f32 %v4966_v12, 0.0  ;;  %v4973_v20 = vadd.f32 %v4079_v13, %v4864_v24 }
 0x3ae   : > { %v5586_v21 = vmax.f32 %v4969_v16, 0.0  ;;  %v4977_v26 = vadd.f32 %v4080_v17, %v4864_v24 }
 0x3af   : > { %v3931_v27 = vpop.f32.mrb[64].mxu1  ;;  %v2531_v30 = vmul.f32 %v4875_v39, %v5588_v18  ;;  %v5584_v34 = vmax.f32 %v4973_v20, 0.0 }
 0x3b0   : > { %v5585_v35 = vmax.f32 %v4977_v26, 0.0  ;;  %v1826_v37 = vpop.f32.mrb[65].mxu1  ;;  %v4027_v43 = vpop.f32.mrb[40].mxu0  ;;  %v2529_v44 = vmul.f32 %v4875_v39, %v5586_v21 }
 0x3b1   : > { %v4081_v48 = vadd.f32 %v4027_v43, %v3931_v27  ;;  %v3932_v49 = vpop.f32.mrb[66].mxu1  ;;  %2581 = vadd.xlane.f32.xlu1 %v2531_v30  ;;  %v2356_v51 = vpop.f32.mrb[41].mxu0  ;;  %v2532_v8 = vmul.f32 %v4875_v39, %v5584_v34 }
 0x3b2   : > { %v4082_v52 = vadd.f32 %v2356_v51, %v1826_v37  ;;  %v1829_v4 = vpop.f32.mrb[67].mxu1  ;;  %2577 = vadd.xlane.f32.xlu0 %v2529_v44  ;;  %v4028_v56 = vpop.f32.mrb[42].mxu0  ;;  %v2530_v59 = vmul.f32 %v4875_v39, %v5585_v35 }
 0x3b3   : > { %v4991_v60 = vadd.f32 %v4081_v48, %v4864_v24  ;;  %v4083_v0 = vadd.f32 %v4028_v56, %v3932_v49  ;;  %v2359_v1 = vpop.f32.mrb[43].mxu0 }
 0x3b4   : > { %v4994_v6 = vadd.f32 %v4082_v52, %v4864_v24  ;;  %v4084_v7 = vadd.f32 %v2359_v1, %v1829_v4 }
 0x3b5   : > { %v5578_v9 = vmax.f32 %v4991_v60, 0.0  ;;  %v5001_v10 = vadd.f32 %v4083_v0, %v4864_v24  ;;  %2579 = vadd.xlane.f32.xlu1 %v2530_v59 }
 0x3b6   : > { %v5004_v11 = vadd.f32 %v4084_v7, %v4864_v24  ;;  %2583 = vadd.xlane.f32.xlu0 %v2532_v8  ;;  %v5582_v13 = vmax.f32 %v4994_v6, 0.0 }
 0x3b7   : > { %v5581_v14 = vmax.f32 %v5001_v10, 0.0  ;;  %v3935_v17 = vpop.f32.mrb[68].mxu1  ;;  %v2535_v27 = vmul.f32 %v4875_v39, %v5578_v9 }
 0x3b8   : > { %v1842_v30 = vpop.f32.mrb[69].mxu1  ;;  %v4031_v37 = vpop.f32.mrb[44].mxu0  ;;  %v5579_v43 = vmax.f32 %v5004_v11, 0.0  ;;  %v2533_v7 = vmul.f32 %v4875_v39, %v5582_v13 }
 0x3b9   : > { %v4085_v44 = vadd.f32 %v4031_v37, %v3935_v17  ;;  %v3936_v48 = vpop.f32.mrb[70].mxu1  ;;  %2589 = vadd.xlane.f32.xlu1 %v2535_v27  ;;  %v2372_v49 = vpop.f32.mrb[45].mxu0  ;;  %v2536_v51 = vmul.f32 %v4875_v39, %v5581_v14 }
 0x3ba   : > { %v4086_v52 = vadd.f32 %v2372_v49, %v1842_v30  ;;  %v1845_v4 = vpop.f32.mrb[71].mxu1  ;;  %v4032_v56 = vpop.f32.mrb[46].mxu0  ;;  %v2534_v37 = vmul.f32 %v4875_v39, %v5579_v43 }
 0x3bb   : > { %v5016_v59 = vadd.f32 %v4085_v44, %v4864_v24  ;;  %v4087_v0 = vadd.f32 %v4032_v56, %v3936_v48  ;;  %2591 = vadd.xlane.f32.xlu0 %v2536_v51  ;;  %v2375_v1 = vpop.f32.mrb[47].mxu0  ;;  %v5036_v48 = vadd.f32 %v4945_v47, %v4864_v24 }
 0x3bc   : > { %v5022_v8 = vadd.f32 %v4086_v52, %v4864_v24  ;;  %v4088_v17 = vadd.f32 %v2375_v1, %v1845_v4  ;;  %v5045_v1 = vadd.f32 %v4954_v54, %v4864_v24 }
 0x3bd   : > { %5627 = vst [vmem:[#allocation13_spill] sm:$0xff] %v5016_v59  ;;  %v5562_v27 = vmax.f32 %v5016_v59, 0.0  ;;  %v5026_v30 = vadd.f32 %v4087_v0, %v4864_v24  ;;  %2585 = vadd.xlane.f32.xlu1 %v2533_v7  ;;  %5631 = vst [vmem:[#allocation17_spill] sm:$0xff] %v5036_v48 }
 0x3be   : > { %5628 = vst [vmem:[#allocation14_spill] sm:$0xff] %v5022_v8  ;;  %v5032_v44 = vadd.f32 %v4088_v17, %v4864_v24  ;;  %v5577_v49 = vmax.f32 %v5022_v8, 0.0  ;;  %5632 = vst [vmem:[#allocation18_spill] sm:$0xff] %v5045_v1 }
 0x3bf   : > { %5629 = vst [vmem:[#allocation15_spill] sm:$0xff] %v5026_v30  ;;  %v5576_v51 = vmax.f32 %v5026_v30, 0.0  ;;  %v3939_v52 = vpop.f32.mrb[72].mxu1  ;;  %2587 = vadd.xlane.f32.xlu0 %v2534_v37  ;;  %v2539_v4 = vmul.f32 %v4875_v39, %v5562_v27  ;;  %v5569_v27 = vmax.f32 %v5036_v48, 0.0 }
 0x3c0   : > { %5630 = vst [vmem:[#allocation16_spill] sm:$0xff] %v5032_v44  ;;  %v1858_v56 = vpop.f32.mrb[73].mxu1  ;;  %v4035_v0 = vpop.f32.mrb[48].mxu0  ;;  %v5575_v7 = vmax.f32 %v5032_v44, 0.0 }
 0x3c1   : > { %v4089_v47 = vadd.f32 %v4035_v0, %v3939_v52  ;;  %v3940_v17 = vpop.f32.mrb[74].mxu1  ;;  %2597 = vadd.xlane.f32.xlu1 %v2539_v4  ;;  %v2388_v22 = vpop.f32.mrb[49].mxu0  ;;  %v2540_v37 = vmul.f32 %v4875_v39, %v5576_v51  ;;  %v2537_v52 = vmul.f32 %v4875_v39, %v5577_v49 }
 0x3c2   : > { %v4090_v28 = vadd.f32 %v2388_v22, %v1858_v56  ;;  %v1861_v25 = vpop.f32.mrb[75].mxu1  ;;  %v4036_v53 = vpop.f32.mrb[50].mxu0  ;;  %v5574_v22 = vmax.f32 %v5045_v1, 0.0 }
 0x3c3   : > { %v5053_v61 = vadd.f32 %v4089_v47, %v4864_v24  ;;  %v4091_v54 = vadd.f32 %v4036_v53, %v3940_v17  ;;  %2599 = vadd.xlane.f32.xlu0 %v2540_v37  ;;  %v2391_v2 = vpop.f32.mrb[51].mxu0  ;;  %v2538_v53 = vmul.f32 %v4875_v39, %v5575_v7 }
 0x3c4   : > { %v5059_v4 = vadd.f32 %v4090_v28, %v4864_v24  ;;  %v4092_v0 = vadd.f32 %v2391_v2, %v1861_v25  ;;  %v2525_v2 = vmul.f32 %v4875_v39, %v5569_v27  ;;  %v2526_v28 = vmul.f32 %v4875_v39, %v5574_v22 }
 0x3c5   : > { %5633 = vst [vmem:[#allocation19_spill] sm:$0xff] %v5053_v61  ;;  %v5063_v56 = vadd.f32 %v4091_v54, %v4864_v24  ;;  %2593 = vadd.xlane.f32.xlu1 %v2537_v52  ;;  %v5565_v37 = vmax.f32 %v5053_v61, 0.0 }
 0x3c6   : > { %5634 = vst [vmem:[#allocation20_spill] sm:$0xff] %v5059_v4  ;;  %v5069_v47 = vadd.f32 %v4092_v0, %v4864_v24  ;;  %v5571_v17 = vmax.f32 %v5059_v4, 0.0  ;;  %v5568_v0 = vmax.f32 %v4948_v50, 0.0 }
 0x3c7   : > { %5635 = vst [vmem:[#allocation21_spill] sm:$0xff] %v5063_v56  ;;  %2595 = vadd.xlane.f32.xlu0 %v2538_v53  ;;  %v5566_v54 = vmax.f32 %v5063_v56, 0.0  ;;  %v2543_v53 = vmul.f32 %v4875_v39, %v5565_v37  ;;  %v5102_v37 = vshrl.u32 %v667_v31, 7  ;;  %v5572_v31 = vmov 1.0|1.0  }
 0x3c8   : > { %5636 = vst [vmem:[#allocation22_spill] sm:$0xff] %v5069_v47  ;;  %v5570_v25 = vmax.f32 %v5069_v47, 0.0  ;;  %v2541_v24 = vmul.f32 %v4875_v39, %v5571_v17 }
 0x3c9   : > { %2569 = vadd.xlane.f32.xlu1 %v2525_v2  ;;  %v5567_v2 = vmax.f32 %v4960_v57, 0.0  ;;  %v5132_v27 = vadd.s32 24, %v5102_v37  ;;  %v2875_v43 = vadd.s32 48, %v5102_v37  ;;  %v2879_v18 = vadd.s32 80, %v5102_v37 }
 0x3ca   : > { %v2542_v52 = vmul.f32 %v4875_v39, %v5570_v25  ;;  %v2891_v61 = vadd.s32 176, %v5102_v37 }
 0x3cb   : > { %2571 = vadd.xlane.f32.xlu0 %v2526_v28  ;;  %v2544_v28 = vmul.f32 %v4875_v39, %v5566_v54  ;;  %v5113_v54 = vadd.s32 8, %v5102_v37  ;;  %5641 = vst [vmem:[#allocation27_spill] sm:$0xff] %v5132_v27 }
 0x3cd   : > { %2601 = vadd.xlane.f32.xlu1 %v2541_v24  ;;  %v2527_v24 = vmul.f32 %v4875_v39, %v5568_v0  ;;  %5638 = vst [vmem:[#allocation24_spill] sm:$0xff] %v5113_v54 }
 0x3cf   : > { %2603 = vadd.xlane.f32.xlu0 %v2542_v52  ;;  %v2528_v52 = vmul.f32 %v4875_v39, %v5567_v2  ;;  %v5126_v2 = vstv %s2609_s21 }
 0x3d1   : > { %2605 = vadd.xlane.f32.xlu1 %v2543_v53  ;;  %v3069_v53 = vsub.s32 1, %v5102_v37 }
 0x3d3   : > { %2607 = vadd.xlane.f32.xlu0 %v2544_v28  ;;  %v5110_v28 = vld [vmem:[%s518_s0] sm:$0x3] }
 0x3d4   : > { %5637 = vst [vmem:[#allocation23_spill] sm:$0xff] %v5110_v28 }
 0x3d5   : > { %2573 = vadd.xlane.f32.xlu1 %v2527_v24  ;;  %v5116_v24 = vrot.slane %v5110_v28, %v3069_v53  ;;  %v5129_v53 = vadd.s32 16, %v5102_v37 }
 0x3d7   : > { %2575 = vadd.xlane.f32.xlu0 %v2528_v52  ;;  %5639 = vst [vmem:[#allocation25_spill] sm:$0xff] %v5116_v24  ;;  %vm3072_vm4 = vcmp.eq.s32.totalorder %v5102_v37, %v5116_v24  ;;  %vm3074_vm5 = vcmp.eq.s32.totalorder %v5113_v54, %v5116_v24  ;;  %v5124_v52 = vstv %s3583_s17  ;;  %5640 = vst [vmem:[#allocation26_spill] sm:$0xff] %v5129_v53 }
 0x3d8   : > { %vm3624_vm6 = vmpackc.low %vm3074_vm5, %vm3072_vm4  ;;  %v2902_v25 = vadd.s32 %v5124_v52, %v5102_v37  ;;  %v2904_v7 = vadd.s32 %v5124_v52, %v5129_v53  ;;  %v2905_v51 = vadd.s32 %v5124_v52, %v5132_v27  ;;  %v5642_v27 = vmov 0.0  }
 0x3d9   : > { %3625 = vmatprep.mubr.msk.bf16.mxu1 %vm3624_vm6, %v5572_v31  ;;  %v2887_v53 = vadd.s32 144, %v5102_v37 }
 0x3da   : > { %vm2934_vm7 = vcmp.lt.s32.totalorder %v2902_v25, 300  ;;  %vm2936_vm8 = vcmp.lt.s32.totalorder %v2904_v7, 300  ;;  %vm2937_vm9 = vcmp.lt.s32.totalorder %v2905_v51, 300  ;;  %v2873_v25 = vadd.s32 32, %v5102_v37 }
 0x3db   : > { %v5156_v7 = vsel %vm2936_vm8, 1.0, %v5592_v38 }
 0x41e   : > { %v2550_v0 = vpop.xlane.xlu1 %2549 }
 0x41f   : > { %v2546_v39 = vpop.xlane.xlu0 %2545  ;;  %v2613_v17 = vadd.f32 %v5126_v2, %v2550_v0 }
 0x420   : > { %v2611_v22 = vadd.f32 %v5126_v2, %v2546_v39  ;;  %v5147_v39 = vsel %vm2934_vm7, 1.0, %v5592_v38 }
 0x421   : > { %v3553_v63 = vmul.f32 -1.442695, %v2613_v17  ;;  %v2908_v17 = vadd.s32 %v5124_v52, %v2875_v43  ;;  %v2906_v43 = vadd.s32 %v5124_v52, %v2873_v25 }
 0x422   : > { %v3551_v19 = vmul.f32 -1.442695, %v2611_v22  ;;  %v2876_v22 = vadd.s32 56, %v5102_v37 }
 0x423   : > { %v2552_v31 = vpop.xlane.xlu0 %2551  ;;  %4196 = vpow2.f32 %v3553_v63  ;;  %v5163_v63 = vsel %vm2937_vm9, 1.0, %v5592_v38  ;;  %vm2940_vm11 = vcmp.lt.s32.totalorder %v2908_v17, 300  ;;  %v2912_v38 = vadd.s32 %v5124_v52, %v2879_v18 }
 0x424   : > { %v2614_v49 = vadd.f32 %v5126_v2, %v2552_v31  ;;  %v2903_v31 = vadd.s32 %v5124_v52, %v5113_v54  ;;  %4198 = vpow2.f32 %v3551_v19  ;;  %v2909_v19 = vadd.s32 %v5124_v52, %v2876_v22 }
 0x425   : > { %v2878_v22 = vadd.s32 72, %v5102_v37  ;;  %vm2938_vm12 = vcmp.lt.s32.totalorder %v2906_v43, 300  ;;  %vm2944_vm15 = vcmp.lt.s32.totalorder %v2912_v38, 300 }
 0x426   : > { %v2558_v9 = vpop.xlane.xlu1 %2557  ;;  %v3554_v34 = vmul.f32 -1.442695, %v2614_v49  ;;  %v2874_v49 = vadd.s32 40, %v5102_v37  ;;  %vm2935_vm10 = vcmp.lt.s32.totalorder %v2903_v31, 300  ;;  %vm2941_vm14 = vcmp.lt.s32.totalorder %v2909_v19, 300 }
 0x427   : > { %v2617_v14 = vadd.f32 %v5126_v2, %v2558_v9  ;;  %v2548_v13 = vpop.xlane.xlu0 %2547  ;;  %v5174_v25 = vsel %vm2935_vm10, 1.0, %v5642_v27  ;;  %v2911_v24 = vadd.s32 %v5124_v52, %v2878_v22  ;;  %v5207_v22 = vsel %vm2944_vm15, 1.0, %v5642_v27 }
 0x428   : > { %v2612_v0 = vadd.f32 %v5126_v2, %v2548_v13  ;;  %4200 = vpow2.f32 %v3554_v34  ;;  %v2907_v51 = vadd.s32 %v5124_v52, %v2874_v49  ;;  %5645 = vst [vmem:[#allocation30_spill] sm:$0xff] %v5207_v22  ;;  %v2888_v19 = vadd.s32 152, %v5102_v37 }
 0x429   : > { %v3557_v9 = vmul.f32 -1.442695, %v2617_v14  ;;  %vm2943_vm3 = vcmp.lt.s32.totalorder %v2911_v24, 300  ;;  %v2890_v22 = vadd.s32 168, %v5102_v37 }
 0x42a   : > { %v2554_v35 = vpop.xlane.xlu1 %2553  ;;  %v3552_v40 = vmul.f32 -1.442695, %v2612_v0  ;;  %vm2939_vm13 = vcmp.lt.s32.totalorder %v2907_v51, 300 }
 0x42b   : > { %v2615_v21 = vadd.f32 %v5126_v2, %v2554_v35  ;;  %v2560_v13 = vpop.xlane.xlu0 %2559  ;;  %v2877_v35 = vadd.s32 64, %v5102_v37  ;;  %4202 = vpow2.f32 %v3557_v9 }
 0x42c   : > { %v2618_v5 = vadd.f32 %v5126_v2, %v2560_v13  ;;  %4204 = vpow2.f32 %v3552_v40  ;;  %v2880_v13 = vadd.s32 88, %v5102_v37  ;;  %v5180_v40 = vsel %vm2940_vm11, 1.0, %v5642_v27 }
 0x42d   : > { %v3555_v0 = vmul.f32 -1.442695, %v2615_v21  ;;  %v2910_v21 = vadd.s32 %v5124_v52, %v2877_v35  ;;  %5643 = vst [vmem:[#allocation28_spill] sm:$0xff] %v5180_v40  ;;  %v4197_v49 = vpop.eup %4196 }
 0x42e   : > { %v2566_v14 = vpop.xlane.xlu1 %2565  ;;  %v3558_v34 = vmul.f32 -1.442695, %v2618_v5  ;;  %v4199_v43 = vpop.eup %4198 }
 0x42f   : > { %v2621_v45 = vadd.f32 %v5126_v2, %v2566_v14  ;;  %v2556_v42 = vpop.xlane.xlu0 %2555  ;;  %4206 = vpow2.f32 %v3555_v0  ;;  %vm2942_vm0 = vcmp.lt.s32.totalorder %v2910_v21, 300  ;;  %v2920_v0 = vadd.s32 %v5124_v52, %v2887_v53 }
 0x430   : > { %v2616_v31 = vadd.f32 %v5126_v2, %v2556_v42  ;;  %v2885_v42 = vadd.s32 128, %v5102_v37  ;;  %4208 = vpow2.f32 %v3558_v34  ;;  %v5196_v34 = vsel %vm2941_vm14, 1.0, %v5642_v27 }
 0x431   : > { %v3561_v9 = vmul.f32 -1.442695, %v2621_v45  ;;  %v2913_v45 = vadd.s32 %v5124_v52, %v2880_v13  ;;  %v2886_v13 = vadd.s32 136, %v5102_v37  ;;  %v2741_v21 = vadd.f32 1.0, %v4197_v49 }
 0x432   : > { %v2562_v14 = vpop.xlane.xlu1 %2561  ;;  %v3556_v35 = vmul.f32 -1.442695, %v2616_v31  ;;  %v2918_v28 = vadd.s32 %v5124_v52, %v2885_v42  ;;  %v4201_v31 = vpop.eup %4200  ;;  %v5200_v53 = vsel %vm2939_vm13, 1.0, %v5642_v27  ;;  %v2739_v50 = vadd.f32 1.0, %v4199_v43 }
 0x433   : > { %v2619_v5 = vadd.f32 %v5126_v2, %v2562_v14  ;;  %v2568_v18 = vpop.xlane.xlu0 %2567  ;;  %4210 = vpow2.f32 %v3561_v9  ;;  %v5189_v14 = vsel %vm2938_vm12, 1.0, %v5642_v27  ;;  %v5203_v9 = vsel %vm2942_vm0, 1.0, %v5642_v27 }
 0x434   : > { %v2622_v17 = vadd.f32 %v5126_v2, %v2568_v18  ;;  %5644 = vst [vmem:[#allocation29_spill] sm:$0xff] %v5203_v9  ;;  %4212 = vpow2.f32 %v3556_v35  ;;  %vm2945_vm1 = vcmp.lt.s32.totalorder %v2913_v45, 300  ;;  %vm2952_vm2 = vcmp.lt.s32.totalorder %v2920_v0, 300 }
 0x435   : > { %v3559_v54 = vmul.f32 -1.442695, %v2619_v5  ;;  %v4203_v5 = vpop.eup %4202  ;;  %v2742_v51 = vadd.f32 1.0, %v4201_v31  ;;  %v2919_v56 = vadd.s32 %v5124_v52, %v2886_v13  ;;  %vm2950_vm4 = vcmp.lt.s32.totalorder %v2918_v28, 300 }
 0x436   : > { %v3562_v18 = vmul.f32 -1.442695, %v2622_v17  ;;  %v4205_v42 = vpop.eup %4204  ;;  %v2745_v38 = vadd.f32 1.0, %v4203_v5  ;;  %v5214_v35 = vsel %vm2945_vm1, 1.0, %v5642_v27  ;;  %v2921_v43 = vadd.s32 %v5124_v52, %v2888_v19 }
 0x437   : > { %v2564_v57 = vpop.xlane.xlu0 %2563  ;;  %4214 = vpow2.f32 %v3559_v54  ;;  %5646 = vst [vmem:[#allocation31_spill] sm:$0xff] %v5214_v35  ;;  %v2740_v45 = vadd.f32 1.0, %v4205_v42  ;;  %v5221_v28 = vsel %vm2950_vm4, 1.0, %v5642_v27  ;;  %v5225_v13 = vsel %vm2952_vm2, 1.0, %v5642_v27 }
 0x438   : > { %v2620_v49 = vadd.f32 %v5126_v2, %v2564_v57  ;;  %4216 = vrcp.f32 %v2741_v21  ;;  %v5218_v57 = vsel %vm2943_vm3, 1.0, %v5642_v27  ;;  %vm2951_vm5 = vcmp.lt.s32.totalorder %v2919_v56, 300 }
 0x439   : > { %v4207_v17 = vpop.eup %4206  ;;  %4218 = vpow2.f32 %v3562_v18  ;;  %5647 = vst [vmem:[#allocation32_spill] sm:$0xff] %v5218_v57  ;;  %v2892_v18 = vadd.s32 184, %v5102_v37  ;;  %vm2953_vm6 = vcmp.lt.s32.totalorder %v2921_v43, 300  ;;  %v2889_v0 = vadd.s32 160, %v5102_v37 }
 0x43a   : > { %4220 = vrcp.f32 %v2739_v50  ;;  %v3560_v54 = vmul.f32 -1.442695, %v2620_v49  ;;  %v4209_v31 = vpop.eup %4208  ;;  %v2743_v50 = vadd.f32 1.0, %v4207_v17  ;;  %v2924_v49 = vadd.s32 %v5124_v52, %v2891_v61 }
 0x43b   : > { %4222 = vrcp.f32 %v2742_v51  ;;  %v2746_v47 = vadd.f32 1.0, %v4209_v31  ;;  %v5236_v61 = vsel %vm2951_vm5, 1.0, %v5642_v27  ;;  %v2925_v31 = vadd.s32 %v5124_v52, %v2892_v18 }
 0x43c   : > { %4224 = vrcp.f32 %v2745_v38  ;;  %vm2956_vm7 = vcmp.lt.s32.totalorder %v2924_v49, 300  ;;  %v2895_v43 = vadd.s32 208, %v5102_v37 }
 0x43d   : > { %v4211_v19 = vpop.eup %4210  ;;  %4226 = vrcp.f32 %v2740_v45  ;;  %v5250_v49 = vsel %vm2956_vm7, 1.0, %v5642_v27  ;;  %vm2957_vm8 = vcmp.lt.s32.totalorder %v2925_v31, 300 }
 0x43e   : > { %v2582_v24 = vpop.xlane.xlu1 %2581  ;;  %4228 = vpow2.f32 %v3560_v54  ;;  %v4213_v4 = vpop.eup %4212  ;;  %v2749_v1 = vadd.f32 1.0, %v4211_v19 }
 0x43f   : > { %v2629_v21 = vadd.f32 %v5126_v2, %v2582_v24  ;;  %v2578_v5 = vpop.xlane.xlu0 %2577  ;;  %v2744_v56 = vadd.f32 1.0, %v4213_v4  ;;  %v2896_v4 = vadd.s32 216, %v5102_v37 }
 0x440   : > { %v2627_v42 = vadd.f32 %v5126_v2, %v2578_v5  ;;  %v5242_v5 = vsel %vm2953_vm6, 1.0, %v5642_v27 }
 0x441   : > { %v3569_v48 = vmul.f32 -1.442695, %v2629_v21  ;;  %v4215_v54 = vpop.eup %4214 }
 0x442   : > { %v3567_v51 = vmul.f32 -1.442695, %v2627_v42  ;;  %v2580_v24 = vpop.xlane.xlu1 %2579  ;;  %v5245_v19 = vpop.eup %4216 }
 0x443   : > { %4230 = vpow2.f32 %v3569_v48  ;;  %v2628_v38 = vadd.f32 %v5126_v2, %v2580_v24  ;;  %v2584_v17 = vpop.xlane.xlu0 %2583  ;;  %v2922_v48 = vadd.s32 %v5124_v52, %v2889_v0  ;;  %v2923_v24 = vadd.s32 %v5124_v52, %v2890_v22 }
 0x444   : > { %4232 = vrcp.f32 %v2743_v50  ;;  %v2630_v45 = vadd.f32 %v5126_v2, %v2584_v17  ;;  %v4219_v17 = vpop.eup %4218  ;;  %v2747_v0 = vadd.f32 1.0, %v4215_v54  ;;  %v2893_v54 = vadd.s32 192, %v5102_v37 }
 0x445   : > { %4234 = vpow2.f32 %v3567_v51  ;;  %v3568_v21 = vmul.f32 -1.442695, %v2628_v38  ;;  %v5253_v51 = vpop.eup %4220  ;;  %vm2954_vm9 = vcmp.lt.s32.totalorder %v2922_v48, 300  ;;  %vm2955_vm10 = vcmp.lt.s32.totalorder %v2923_v24, 300 }
 0x446   : > { %4236 = vrcp.f32 %v2746_v47  ;;  %v3570_v42 = vmul.f32 -1.442695, %v2630_v45  ;;  %v2590_v50 = vpop.xlane.xlu1 %2589  ;;  %v5256_v47 = vpop.eup %4222  ;;  %v5267_v48 = vsel %vm2954_vm9, 1.0, %v5642_v27  ;;  %v5280_v59 = vsel %vm2955_vm10, 1.0, %v5642_v27 }
 0x447   : > { %4238 = vrcp.f32 %v2749_v1  ;;  %v2633_v18 = vadd.f32 %v5126_v2, %v2590_v50  ;;  %v5259_v45 = vpop.eup %4224  ;;  %v2750_v50 = vadd.f32 1.0, %v4219_v17  ;;  %v2929_v17 = vadd.s32 %v5124_v52, %v2896_v4 }
 0x448   : > { %4240 = vpow2.f32 %v3568_v21  ;;  %v2592_v38 = vpop.xlane.xlu0 %2591  ;;  %v5262_v21 = vpop.eup %4226  ;;  %v2926_v31 = vadd.s32 %v5124_v52, %v2893_v54 }
 0x449   : > { %4242 = vpow2.f32 %v3570_v42  ;;  %v3573_v22 = vmul.f32 -1.442695, %v2633_v18  ;;  %v2634_v1 = vadd.f32 %v5126_v2, %v2592_v38  ;;  %v2928_v42 = vadd.s32 %v5124_v52, %v2895_v43  ;;  %v4229_v18 = vpop.eup %4228 }
 0x44a   : > { %4244 = vrcp.f32 %v2744_v56  ;;  %v2586_v35 = vpop.xlane.xlu1 %2585  ;;  %v5271_v56 = vsel %vm2957_vm8, 1.0, %v5642_v27  ;;  %vm2961_vm12 = vcmp.lt.s32.totalorder %v2929_v17, 300  ;;  %vm2958_vm13 = vcmp.lt.s32.totalorder %v2926_v31, 300 }
 0x44b   : > { %4246 = vpow2.f32 %v3573_v22  ;;  %v3574_v15 = vmul.f32 -1.442695, %v2634_v1  ;;  %v2631_v9 = vadd.f32 %v5126_v2, %v2586_v35  ;;  %v2894_v35 = vadd.s32 200, %v5102_v37 }
 0x44c   : > { %4248 = vrcp.f32 %v2747_v0  ;;  %v2588_v38 = vpop.xlane.xlu0 %2587  ;;  %vm2960_vm11 = vcmp.lt.s32.totalorder %v2928_v42, 300  ;;  %v2882_v42 = vadd.s32 104, %v5102_v37  ;;  %v2897_v17 = vadd.s32 224, %v5102_v37 }
 0x44d   : > { %v4231_v23 = vpop.eup %4230  ;;  %4250 = vpow2.f32 %v3574_v15  ;;  %v3571_v22 = vmul.f32 -1.442695, %v2631_v9  ;;  %v2632_v1 = vadd.f32 %v5126_v2, %v2588_v38  ;;  %v2748_v38 = vadd.f32 1.0, %v4229_v18 }
 0x44e   : > { %v5276_v43 = vpop.eup %4232  ;;  %4252 = vrcp.f32 %v2750_v50  ;;  %v2757_v0 = vadd.f32 1.0, %v4231_v23  ;;  %v2598_v57 = vpop.xlane.xlu1 %2597  ;;  %v2927_v54 = vadd.s32 %v5124_v52, %v2894_v35 }
 0x44f   : > { %v4235_v44 = vpop.eup %4234  ;;  %4254 = vpow2.f32 %v3571_v22  ;;  %v3572_v4 = vmul.f32 -1.442695, %v2632_v1  ;;  %v2637_v15 = vadd.f32 %v5126_v2, %v2598_v57  ;;  %v5292_v57 = vsel %vm2960_vm11, 1.0, %v5642_v27 }
 0x450   : > { %v5284_v9 = vpop.eup %4236  ;;  %4256 = vrcp.f32 %v2757_v0  ;;  %v2755_v32 = vadd.f32 1.0, %v4235_v44  ;;  %v2600_v50 = vpop.xlane.xlu0 %2599  ;;  %5649 = vst [vmem:[#allocation34_spill] sm:$0xff] %v5292_v57  ;;  %v2881_v44 = vadd.s32 96, %v5102_v37  ;;  %vm2959_vm14 = vcmp.lt.s32.totalorder %v2927_v54, 300 }
 0x451   : > { %v5286_v23 = vpop.eup %4238  ;;  %4258 = vpow2.f32 %v3572_v4  ;;  %v3577_v24 = vmul.f32 -1.442695, %v2637_v15  ;;  %v2638_v30 = vadd.f32 %v5126_v2, %v2600_v50  ;;  %v5319_v31 = vsel %vm2959_vm14, 1.0, %v5642_v27 }
 0x452   : > { %5648 = vst [vmem:[#allocation33_spill] sm:$0xff] %v5286_v23  ;;  %v4241_v22 = vpop.eup %4240  ;;  %4260 = vrcp.f32 %v2755_v32  ;;  %v2594_v1 = vpop.xlane.xlu1 %2593  ;;  %v5300_v32 = vsel %vm2961_vm12, 1.0, %v5642_v27  ;;  %5655 = vst [vmem:[#allocation40_spill] sm:$0xff] %v5319_v31  ;;  %v5332_v31 = vadd.s32 %v5124_v52, %v2897_v17  ;;  %v5659_v17 = vmax.f32 %v4966_v12, 0.0 }
 0x453   : > { %v4243_v18 = vpop.eup %4242  ;;  %v2756_v0 = vadd.f32 1.0, %v4241_v22  ;;  %4262 = vpow2.f32 %v3577_v24  ;;  %v3578_v23 = vmul.f32 -1.442695, %v2638_v30  ;;  %v2635_v4 = vadd.f32 %v5126_v2, %v2594_v1  ;;  %5650 = vst [vmem:[#allocation35_spill] sm:$0xff] %v5300_v32 }
 0x454   : > { %v5296_v15 = vpop.eup %4244  ;;  %4264 = vrcp.f32 %v2748_v38  ;;  %v2758_v35 = vadd.f32 1.0, %v4243_v18  ;;  %v2596_v50 = vpop.xlane.xlu0 %2595  ;;  %v5308_v38 = vsel %vm2958_vm13, 1.0, %v5642_v27  ;;  %vm2962_vm0 = vcmp.lt.s32.totalorder %v5332_v31, 300 }
 0x455   : > { %v4247_v57 = vpop.eup %4246  ;;  %4266 = vrcp.f32 %v2756_v0  ;;  %v3575_v8 = vmul.f32 -1.442695, %v2635_v4  ;;  %v2636_v22 = vadd.f32 %v5126_v2, %v2596_v50  ;;  %5652 = vst [vmem:[#allocation37_spill] sm:$0xff] %v5308_v38  ;;  %v5313_v4 = vadd.s32 %v5124_v52, %v2881_v44 }
 0x456   : > { %v5304_v30 = vpop.eup %4248  ;;  %4268 = vrcp.f32 %v2758_v35  ;;  %v2761_v24 = vadd.f32 1.0, %v4247_v57  ;;  %v2570_v1 = vpop.xlane.xlu1 %2569  ;;  %v5322_v38 = vadd.s32 %v5124_v52, %v2882_v42  ;;  %v5326_v44 = vadd.s32 232, %v5102_v37 }
 0x457   : > { %5651 = vst [vmem:[#allocation36_spill] sm:$0xff] %v5304_v30  ;;  %v4251_v18 = vpop.eup %4250  ;;  %4270 = vpow2.f32 %v3578_v23  ;;  %v3576_v32 = vmul.f32 -1.442695, %v2636_v22  ;;  %v2623_v0 = vadd.f32 %v5126_v2, %v2570_v1  ;;  %5653 = vst [vmem:[#allocation38_spill] sm:$0xff] %v5313_v4 }
 0x458   : > { %v5315_v50 = vpop.eup %4252  ;;  %4272 = vrcp.f32 %v2761_v24  ;;  %v2762_v35 = vadd.f32 1.0, %v4251_v18  ;;  %v2572_v57 = vpop.xlane.xlu0 %2571  ;;  %vm2947_vm15 = vcmp.lt.s32.totalorder %v5322_v38, 300  ;;  %v5396_v38 = vadd.s32 %v5124_v52, %v5326_v44 }
 0x459   : > { %5654 = vst [vmem:[#allocation39_spill] sm:$0xff] %v5315_v50  ;;  %v4255_v30 = vpop.eup %4254  ;;  %4274 = vpow2.f32 %v3575_v8  ;;  %v3563_v23 = vmul.f32 -1.442695, %v2623_v0  ;;  %v2624_v22 = vadd.f32 %v5126_v2, %v2572_v57  ;;  %v5656_v50 = vmax.f32 %v4870_v36, 0.0 }
 0x45a   : > { %v4257_v1 = vpop.eup %4256  ;;  %4276 = vrcp.f32 %v2762_v35  ;;  %v2759_v24 = vadd.f32 1.0, %v4255_v30  ;;  %v2602_v18 = vpop.xlane.xlu1 %2601  ;;  %v5657_v57 = vmax.f32 %v4879_v41, 0.0  ;;  %v5658_v36 = vmax.f32 %v4887_v46, 0.0 }
 0x45b   : > { %v2835_v54 = vmul.f32 %v5253_v51, %v5656_v50  ;;  %v4259_v42 = vpop.eup %4258  ;;  %4278 = vpow2.f32 %v3576_v32  ;;  %v3564_v8 = vmul.f32 -1.442695, %v2624_v22  ;;  %v2639_v0 = vadd.f32 %v5126_v2, %v2602_v18 }
 0x45c   : > { %v2838_v29 = vmul.f32 %v5256_v47, %v5657_v57  ;;  %v4261_v40 = vpop.eup %4260  ;;  %4280 = vrcp.f32 %v2759_v24  ;;  %v2760_v30 = vadd.f32 1.0, %v4259_v42  ;;  %v2604_v35 = vpop.xlane.xlu0 %2603  ;;  %v2836_v51 = vmul.f32 %v5262_v21, %v5658_v36 }
 0x45d   : > { %v2853_v50 = vmul.f32 %v4257_v1, %v5659_v17  ;;  %v4263_v4 = vpop.eup %4262  ;;  %4282 = vpow2.f32 %v3563_v23  ;;  %v3579_v32 = vmul.f32 -1.442695, %v2639_v0  ;;  %v2640_v22 = vadd.f32 %v5126_v2, %v2604_v35 }
 0x45e   : > { %v5660_v41 = vmax.f32 %v4867_v33, 0.0  ;;  %v5348_v24 = vpop.eup %4264  ;;  %4284 = vrcp.f32 %v2760_v30  ;;  %v2765_v46 = vadd.f32 1.0, %v4263_v4  ;;  %v2606_v18 = vpop.xlane.xlu1 %2605  ;;  %v5661_v21 = vmax.f32 %v4969_v16, 0.0 }
 0x45f   : > { %v3030_v1 = vmul.f32 %v5147_v39, %v2835_v54  ;;  %v4267_v23 = vpop.eup %4266  ;;  %4286 = vpow2.f32 %v3564_v8  ;;  %v3580_v42 = vmul.f32 -1.442695, %v2640_v22  ;;  %v2641_v0 = vadd.f32 %v5126_v2, %v2606_v18 }
 0x460   : > { %v2837_v47 = vmul.f32 %v5245_v19, %v5660_v41  ;;  %v2851_v12 = vmul.f32 %v4261_v40, %v5661_v21  ;;  %v5355_v33 = vmul.f32 %v5163_v63, %v2838_v29  ;;  %v4269_v19 = vpop.eup %4268  ;;  %4288 = vrcp.f32 %v2765_v46  ;;  %v2608_v57 = vpop.xlane.xlu0 %2607 }
 0x461   : > { %v5662_v30 = vmax.f32 %v4977_v26, 0.0  ;;  %v3031_v35 = vmul.f32 %v5174_v25, %v2836_v51  ;;  %v3048_v16 = vmul.f32 %v5225_v13, %v2853_v50  ;;  %v4271_v40 = vpop.eup %4270  ;;  %4290 = vpow2.f32 %v3579_v32 }
 0x462   : > { %v3581_v39 = vmul.f32 -1.442695, %v2641_v0  ;;  %v2642_v54 = vadd.f32 %v5126_v2, %v2608_v57  ;;  %v5663_v8 = vmax.f32 %v4973_v20, 0.0  ;;  %v4273_v29 = vpop.eup %4272  ;;  %v2766_v63 = vadd.f32 1.0, %v4271_v40  ;;  %v2574_v17 = vpop.xlane.xlu1 %2573 }
 0x463   : > { %v2852_v4 = vmul.f32 %v4267_v23, %v5662_v30  ;;  %4292 = vpow2.f32 %v3580_v42  ;;  %v3046_v22 = vmul.f32 %v5221_v28, %v2851_v12  ;;  %v4275_v41 = vpop.eup %4274  ;;  %v2625_v13 = vadd.f32 %v5126_v2, %v2574_v17 }
 0x464   : > { %v2854_v36 = vmul.f32 %v4269_v19, %v5663_v8  ;;  %4294 = vpow2.f32 %v3581_v39  ;;  %v3582_v25 = vmul.f32 -1.442695, %v2642_v54  ;;  %v4277_v50 = vpop.eup %4276  ;;  %v2763_v32 = vadd.f32 1.0, %v4275_v41  ;;  %v2576_v20 = vpop.xlane.xlu0 %2575 }
 0x465   : > { %v3047_v26 = vmul.f32 %v5236_v61, %v2852_v4  ;;  %4296 = vrcp.f32 %v2766_v63  ;;  %v3103_v18 = vpack.c.bf16 %v3031_v35, %v3030_v1  ;;  %v4279_v21 = vpop.eup %4278  ;;  %v3565_v23 = vmul.f32 -1.442695, %v2625_v13 }
 0x466   : > { %v3049_v51 = vmul.f32 %v5242_v5, %v2854_v36  ;;  %4298 = vpow2.f32 %v3582_v25  ;;  %v2626_v28 = vadd.f32 %v5126_v2, %v2576_v20  ;;  %v4281_v61 = vpop.eup %4280  ;;  %v2764_v42 = vadd.f32 1.0, %v4279_v21  ;;  %v5674_v21 = vld [vmem:[#allocation10_spill] sm:$0xff] }
 0x467   : > { %v3111_v46 = vpack.c.bf16 %v3047_v26, %v3046_v22  ;;  %4300 = vrcp.f32 %v2763_v32  ;;  %v3032_v0 = vmul.f32 %v5156_v7, %v2837_v47  ;;  %v5664_v5 = vmax.f32 %v4912_v3, 0.0  ;;  %v4283_v57 = vpop.eup %4282 }
 0x468   : > { %v3112_v12 = vpack.c.bf16 %v3049_v51, %v3048_v16  ;;  %4302 = vpow2.f32 %v3565_v23  ;;  %v3566_v30 = vmul.f32 -1.442695, %v2626_v28  ;;  %v5665_v1 = vmax.f32 %v4994_v6, 0.0  ;;  %v4285_v16 = vpop.eup %4284 }
 0x469   : > { %3763 = vmatprep.subr.bf16.mxu1 %v3111_v46  ;;  %v2840_v19 = vmul.f32 %v5296_v15, %v5664_v5  ;;  %v5666_v2 = vmax.f32 %v5001_v10, 0.0  ;;  %4304 = vrcp.f32 %v2764_v42  ;;  %v3104_v40 = vpack.c.bf16 %v5355_v33, %v3032_v0  ;;  %v4287_v47 = vpop.eup %4286  ;;  %v5678_v0 = vld [vmem:[#allocation15_spill] sm:$0xff] }
 0x46a   : > { %3764 = vmatpush3.bf16.msra.mxu1 %v3103_v18  ;;  %v2855_v4 = vmul.f32 %v4281_v61, %v5665_v1  ;;  %v5667_v7 = vmax.f32 %v4897_v58, 0.0  ;;  %v5384_v15 = vsel %vm2947_vm15, 1.0, %v5642_v27  ;;  %v2751_v6 = vadd.f32 1.0, %v4283_v57  ;;  %v4289_v36 = vpop.eup %4288 }
 0x46b   : > { %v2858_v35 = vmul.f32 %v4277_v50, %v5666_v2  ;;  %3765 = vmatprep.subr.bf16.mxu1 %v3112_v12  ;;  %4306 = vpow2.f32 %v3566_v30  ;;  %v5668_v10 = vmax.f32 %v5004_v11, 0.0  ;;  %v5669_v54 = vmax.f32 %v4991_v60, 0.0  ;;  %v4291_v17 = vpop.eup %4290  ;;  %v5676_v12 = vld [vmem:[#allocation14_spill] sm:$0xff]  ;;  %v5680_v2 = vld [vmem:[#allocation8_spill] sm:$0xff] }
 0x46c   : > { %v2839_v3 = vmul.f32 %v5276_v43, %v5667_v7  ;;  %v2752_v33 = vadd.f32 1.0, %v4287_v47  ;;  %v3035_v58 = vmul.f32 %v5200_v53, %v2840_v19  ;;  %v5670_v43 = vmax.f32 %v4904_v62, 0.0  ;;  %v5683_v7 = vld [vmem:[#allocation16_spill] sm:$0xff] }
 0x46d   : > { %v2856_v39 = vmul.f32 %v4285_v16, %v5668_v10  ;;  %v2857_v8 = vmul.f32 %v4273_v29, %v5669_v54  ;;  %v3050_v11 = vmul.f32 %v5267_v48, %v2855_v4  ;;  %v3053_v60 = vmul.f32 %v5271_v56, %v2858_v35  ;;  %v4293_v26 = vpop.eup %4292  ;;  %v5682_v16 = vld [vmem:[#allocation36_spill] sm:$0xff] }
 0x46e   : > { %v2842_v63 = vmul.f32 %v5284_v9, %v5670_v43  ;;  %3766 = vmatpush3.bf16.msra.mxu1 %v3104_v40  ;;  %v2899_v29 = vadd.s32 240, %v5102_v37  ;;  %4308 = vrcp.f32 %v2752_v33  ;;  %v2767_v53 = vadd.f32 1.0, %v4291_v17  ;;  %v4295_v41 = vpop.eup %4294 }
 0x46f   : > { %v3051_v22 = vmul.f32 %v5280_v59, %v2856_v39  ;;  %v3034_v62 = vmul.f32 %v5189_v14, %v2839_v3  ;;  %v5671_v9 = vmax.f32 %v4893_v55, 0.0  ;;  %4310 = vrcp.f32 %v2751_v6  ;;  %v4297_v59 = vpop.eup %4296  ;;  %v5672_v55 = vld [vmem:[#allocation38_spill] sm:$0xff]  ;;  %v5685_v6 = vld [vmem:[#allocation13_spill] sm:$0xff] }
 0x470   : > { %v2768_v25 = vadd.f32 1.0, %v4293_v26  ;;  %v3052_v48 = vmul.f32 %v5250_v49, %v2857_v8  ;;  %4312 = vrcp.f32 %v2767_v53  ;;  %v2769_v56 = vadd.f32 1.0, %v4295_v41  ;;  %v4299_v32 = vpop.eup %4298  ;;  %v5673_v49 = vld [vmem:[#allocation28_spill] sm:$0xff]  ;;  %v5694_v41 = vld [vmem:[#allocation29_spill] sm:$0xff] }
 0x471   : > { %v2841_v44 = vmul.f32 %v5259_v45, %v5671_v9  ;;  %v3113_v13 = vpack.c.bf16 %v3051_v22, %v3050_v11  ;;  %v3105_v51 = vpack.c.bf16 %v3035_v58, %v3034_v62  ;;  %v3037_v50 = vmul.f32 %v5196_v34, %v2842_v63  ;;  %v4301_v20 = vpop.eup %4300  ;;  %v5687_v58 = vld [vmem:[#allocation32_spill] sm:$0xff]  ;;  %v5688_v63 = vld [vmem:[#allocation9_spill] sm:$0xff]  ;;  %v5690_v11 = vld [vmem:[#allocation39_spill] sm:$0xff] }
 0x472   : > { %4314 = vrcp.f32 %v2768_v25  ;;  %v3114_v14 = vpack.c.bf16 %v3053_v60, %v3052_v48  ;;  %vm2946_vm1 = vcmp.lt.s32.totalorder %v5672_v55, 300  ;;  %v2900_v45 = vadd.s32 248, %v5102_v37  ;;  %v4303_v28 = vpop.eup %4302  ;;  %v5691_v60 = vld [vmem:[#allocation37_spill] sm:$0xff]  ;;  %v5692_v26 = vld [vmem:[#allocation40_spill] sm:$0xff]  ;;  %v5693_v62 = vld [vmem:[#allocation35_spill] sm:$0xff] }
 0x473   : > { %3767 = vmatprep.subr.bf16.mxu1 %v3113_v13  ;;  %4316 = vrcp.f32 %v2769_v56  ;;  %v2770_v46 = vadd.f32 1.0, %v4299_v32  ;;  %v3036_v18 = vmul.f32 %v5673_v49, %v2841_v44  ;;  %v5675_v23 = vmax.f32 %v5674_v21, 0.0  ;;  %v4305_v30 = vpop.eup %4304  ;;  %v5695_v13 = vld [vmem:[#allocation7_spill] sm:$0xff]  ;;  %v5711_v55 = vld [vmem:[#allocation21_spill] sm:$0xff] }
 0x474   : > { %3768 = vmatpush3.bf16.msra.mxu1 %v3105_v51  ;;  %v5677_v61 = vmax.f32 %v5676_v12, 0.0  ;;  %v5679_v5 = vmax.f32 %v5678_v0, 0.0  ;;  %vm2963_vm2 = vcmp.lt.s32.totalorder %v5396_v38, 300  ;;  %v2932_v57 = vadd.s32 %v5124_v52, %v2899_v29 }
 0x475   : > { %v2844_v34 = vmul.f32 %v5348_v24, %v5675_v23  ;;  %3769 = vmatprep.subr.bf16.mxu1 %v3114_v14  ;;  %4318 = vrcp.f32 %v2770_v46  ;;  %v2753_v1 = vadd.f32 1.0, %v4303_v28  ;;  %v3106_v4 = vpack.c.bf16 %v3037_v50, %v3036_v18  ;;  %v4307_v40 = vpop.eup %4306  ;;  %v5698_v14 = vld [vmem:[#allocation34_spill] sm:$0xff]  ;;  %v5699_v18 = vld [vmem:[#allocation31_spill] sm:$0xff] }
 0x476   : > { %v2859_v42 = vmul.f32 %v4301_v20, %v5677_v61  ;;  %v2862_v19 = vmul.f32 %v4297_v59, %v5679_v5  ;;  %v5681_v35 = vmax.f32 %v5680_v2, 0.0  ;;  %v5684_v3 = vmax.f32 %v5683_v7, 0.0  ;;  %v5697_v59 = vld [vmem:[#allocation33_spill] sm:$0xff]  ;;  %v5700_v23 = vld [vmem:[#allocation18_spill] sm:$0xff]  ;;  %v5702_v61 = vld [vmem:[#allocation20_spill] sm:$0xff] }
 0x477   : > { %v5686_v10 = vmax.f32 %v5685_v6, 0.0  ;;  %v2933_v54 = vadd.s32 %v5124_v52, %v2900_v45  ;;  %v2883_v8 = vadd.s32 112, %v5102_v37  ;;  %4320 = vrcp.f32 %v2753_v1 }
 0x478   : > { %v2843_v24 = vmul.f32 %v5682_v16, %v5681_v35  ;;  %v2860_v47 = vmul.f32 %v4305_v30, %v5684_v3  ;;  %v2754_v33 = vadd.f32 1.0, %v4307_v40  ;;  %3770 = vmatpush3.bf16.msra.mxu1 %v3106_v4  ;;  %v3039_v43 = vmul.f32 %v5687_v58, %v2844_v34  ;;  %v4309_v44 = vpop.eup %4308  ;;  %v5704_v30 = vld [vmem:[#allocation30_spill] sm:$0xff]  ;;  %v5707_v16 = vld [vmem:[#allocation17_spill] sm:$0xff]  ;;  %v5709_v3 = vld [vmem:[#allocation19_spill] sm:$0xff] }
 0x479   : > { %v2861_v39 = vmul.f32 %v4289_v36, %v5686_v10  ;;  %v5689_v17 = vmax.f32 %v5688_v63, 0.0  ;;  %v3054_v29 = vmul.f32 %v5691_v60, %v2859_v42  ;;  %v3057_v9 = vmul.f32 %v5693_v62, %v2862_v19  ;;  %v4311_v50 = vpop.eup %4310  ;;  %v5705_v4 = vld [vmem:[#allocation22_spill] sm:$0xff] }
 0x47a   : > { %v3055_v53 = vmul.f32 %v5692_v26, %v2860_v47  ;;  %v2884_v36 = vadd.s32 120, %v5102_v37  ;;  %4322 = vrcp.f32 %v2754_v33  ;;  %v3038_v25 = vmul.f32 %v5694_v41, %v2843_v24  ;;  %v4313_v46 = vpop.eup %4312  ;;  %v5713_v26 = vld [vmem:[#allocation11_spill] sm:$0xff] }
 0x47b   : > { %v2846_v22 = vmul.f32 %v5690_v11, %v5689_v17  ;;  %v5696_v48 = vmax.f32 %v5695_v13, 0.0  ;;  %v3612_v51 = vsel %vm2962_vm0, 1.0, %v5642_v27  ;;  %v3056_v45 = vmul.f32 %v5698_v14, %v2861_v39  ;;  %v5715_v41 = vld [vmem:[#allocation23_spill] sm:$0xff] }
 0x47c   : > { %v3115_v32 = vpack.c.bf16 %v3055_v53, %v3054_v29  ;;  %v3613_v20 = vsel %vm2963_vm2, 1.0, %v5642_v27  ;;  %vm2964_vm3 = vcmp.lt.s32.totalorder %v2932_v57, 300  ;;  %v3107_v49 = vpack.c.bf16 %v3039_v43, %v3038_v25  ;;  %v4315_v12 = vpop.eup %4314 }
 0x47d   : > { %v2845_v56 = vmul.f32 %v5697_v59, %v5696_v48  ;;  %v3041_v21 = vmul.f32 %v5699_v18, %v2846_v22  ;;  %v5701_v34 = vmax.f32 %v5700_v23, 0.0  ;;  %vm2965_vm4 = vcmp.lt.s32.totalorder %v2933_v54, 300  ;;  %v4317_v19 = vpop.eup %4316  ;;  %v5716_v48 = vld [vmem:[#allocation12_spill] sm:$0xff] }
 0x47e   : > { %3771 = vmatprep.subr.bf16.mxu1 %v3115_v32  ;;  %v3116_v31 = vpack.c.bf16 %v3057_v9, %v3056_v45  ;;  %v5703_v42 = vmax.f32 %v5702_v61, 0.0  ;;  %v2916_v5 = vadd.s32 %v5124_v52, %v2883_v8  ;;  %v2917_v38 = vadd.s32 %v5124_v52, %v2884_v36  ;;  %v5718_v32 = vld [vmem:[#allocation24_spill] sm:$0xff]  ;;  %v5719_v45 = vld [vmem:[#allocation25_spill] sm:$0xff] }
 0x47f   : > { %v2848_v28 = vmul.f32 %v4309_v44, %v5701_v34  ;;  %3772 = vmatpush3.bf16.msra.mxu1 %v3107_v49  ;;  %v3040_v1 = vmul.f32 %v5704_v30, %v2845_v56  ;;  %v5706_v2 = vmax.f32 %v5705_v4, 0.0  ;;  %v5708_v24 = vmax.f32 %v5707_v16, 0.0  ;;  %v4319_v8 = vpop.eup %4318  ;;  %v3099_v49 = vld [vmem:[#allocation2] sm:$0xff]  ;;  %v3100_v34 = vld [vmem:[#allocation2 + $0x8] sm:$0xff]  ;;  %v3102_v30 = vld [vmem:[#allocation2 + $0x18] sm:$0xff] }
 0x480   : > { %v2863_v0 = vmul.f32 %v4313_v46, %v5703_v42  ;;  %v3596_v7 = vsel %vm2946_vm1, 1.0, %v5642_v27  ;;  %3773 = vmatprep.subr.bf16.mxu1 %v3116_v31  ;;  %v5710_v47 = vmax.f32 %v5709_v3, 0.0  ;;  %v3614_v52 = vsel %vm2964_vm3, 1.0, %v5642_v27  ;;  %v4324_v16 = vld [vmem:[%s5555_s12] sm:$0xff] (!%p3632_p6)  }
 0x481   : > { %v2864_v35 = vmul.f32 %v4315_v12, %v5706_v2  ;;  %v2847_v40 = vmul.f32 %v4311_v50, %v5708_v24  ;;  %v3615_v10 = vsel %vm2965_vm4, 1.0, %v5642_v27  ;;  %v3065_v39 = vsub.s32 0, %v5102_v37  ;;  %v4321_v22 = vpop.eup %4320  ;;  %v4325_v24 = vld [vmem:[%s5555_s12 + $0x8] sm:$0xff] (!%p3632_p6)   ;;  %4037 = vmatprep.subr.bf16.mxu0 (!%p3632_p6), %v4324_v16 }
 0x482   : > { %v2865_v6 = vmul.f32 %v4317_v19, %v5710_v47  ;;  %v3108_v33 = vpack.c.bf16 %v3041_v21, %v3040_v1  ;;  %v3058_v58 = vmul.f32 %v3612_v51, %v2863_v0  ;;  %v3043_v63 = vmul.f32 %v5384_v15, %v2848_v28  ;;  %v3101_v0 = vld [vmem:[#allocation2 + $0x10] sm:$0xff]  ;;  %4038 = vmatpush3.bf16.msra.mxu0 (!%p3632_p6), %v4324_v16 }
 0x483   : > { %v3059_v43 = vmul.f32 %v3613_v20, %v2864_v35  ;;  %v5712_v17 = vmax.f32 %v5711_v55, 0.0  ;;  %vm2948_vm5 = vcmp.lt.s32.totalorder %v2916_v5, 300  ;;  %vm2949_vm6 = vcmp.lt.s32.totalorder %v2917_v38, 300  ;;  %v5720_v20 = vld [vmem:[#allocation26_spill] sm:$0xff]  ;;  %4039 = vmatprep.subr.bf16.mxu0 (!%p3632_p6), %v4325_v24  ;;  %v3180_v55 = vld [vmem:[#allocation4] sm:$0xff] (!%p3632_p6) }
 0x484   : > { %3774 = vmatpush3.bf16.msra.mxu1 %v3108_v33  ;;  %v3042_v60 = vmul.f32 %v3596_v7, %v2847_v40  ;;  %v3060_v29 = vmul.f32 %v3614_v52, %v2865_v6  ;;  %v5714_v53 = vmax.f32 %v5713_v26, 0.0  ;;  %v4323_v9 = vpop.eup %4322  ;;  %v3598_v44 = vsel %vm2948_vm5, 1.0, %v5642_v27  ;;  %v4326_v40 = vld [vmem:[%s5555_s12 + $0x10] sm:$0xff] (!%p3632_p6)   ;;  %v4327_v7 = vld [vmem:[%s5555_s12 + $0x18] sm:$0xff] (!%p3632_p6)   ;;  %v4328_v52 = vld [vmem:[%s5555_s12 + $0x20] sm:$0xff] (!%p3632_p6)  }
 0x485   : > { %v2866_v11 = vmul.f32 %v4319_v8, %v5712_v17  ;;  %v3117_v57 = vpack.c.bf16 %v3059_v43, %v3058_v58  ;;  %v3599_v15 = vsel %vm2949_vm6, 1.0, %v5642_v27  ;;  %v3066_v25 = vrot.slane %v5715_v41, %v3065_v39  ;;  %v5721_v27 = vld [vmem:[#allocation27_spill] sm:$0xff]  ;;  %v4330_v39 = vld [vmem:[%s5555_s12 + $0x30] sm:$0xff] (!%p3632_p6)   ;;  %v4331_v8 = vld [vmem:[%s5555_s12 + $0x38] sm:$0xff] (!%p3632_p6)  }
 0x486   : > { %v2849_v62 = vmul.f32 %v4321_v22, %v5714_v53  ;;  %v3109_v36 = vpack.c.bf16 %v3043_v63, %v3042_v60  ;;  %v5717_v59 = vmax.f32 %v5716_v48, 0.0  ;;  %vm3076_vm9 = vcmp.eq.s32.totalorder %v5720_v20, %v5719_v45  ;;  %4040 = vmatpush3.bf16.msra.mxu0 (!%p3632_p6), %v4325_v24  ;;  %v3182_v63 = vld [vmem:[#allocation4 + $0x10] sm:$0xff] (!%p3632_p6)  ;;  %v3181_v60 = vld [vmem:[#allocation4 + $0x8] sm:$0xff] (!%p3632_p6) }
 0x487   : > { %v3061_v54 = vmul.f32 %v3615_v10, %v2866_v11  ;;  %3775 = vmatprep.subr.bf16.mxu1 %v3117_v57  ;;  %vm3071_vm7 = vcmp.eq.s32.totalorder %v5102_v37, %v3066_v25  ;;  %vm3073_vm8 = vcmp.eq.s32.totalorder %v5718_v32, %v3066_v25  ;;  %vm3078_vm10 = vcmp.eq.s32.totalorder %v5721_v27, %v5719_v45  ;;  %v4329_v10 = vld [vmem:[%s5555_s12 + $0x28] sm:$0xff] (!%p3632_p6)   ;;  %v3183_v11 = vld [vmem:[#allocation4 + $0x18] sm:$0xff] (!%p3632_p6) }
 0x488   : > { %v2850_v56 = vmul.f32 %v4323_v9, %v5717_v59  ;;  %3776 = vmatpush3.bf16.msra.mxu1 %v3109_v36  ;;  %v3044_v51 = vmul.f32 %v3598_v44, %v2849_v62  ;;  %vm3626_vm11 = vmpackc.low %vm3073_vm8, %vm3071_vm7  ;;  %v5722_v46 = vmov 1.0|1.0   ;;  %vm3075_vm13 = vcmp.eq.s32.totalorder %v5720_v20, %v3066_v25  ;;  %4041 = vmatprep.subr.bf16.mxu0 (!%p3632_p6), %v4326_v40 }
 0x489   : > { %v3118_v13 = vpack.c.bf16 %v3061_v54, %v3060_v29  ;;  %vm3628_vm12 = vmpackc.low %vm3078_vm10, %vm3076_vm9  ;;  %vm3077_vm14 = vcmp.eq.s32.totalorder %v5721_v27, %v3066_v25 }
 0x48a   : > { %v3045_v50 = vmul.f32 %v3599_v15, %v2850_v56  ;;  %vm3630_vm15 = vmpackc.low %vm3077_vm14, %vm3075_vm13  ;;  %4042 = vmatpush3.bf16.msra.mxu0 (!%p3632_p6), %v4326_v40 }
 0x48b   : > { %3777 = vmatprep.subr.bf16.mxu1 %v3118_v13  ;;  %4043 = vmatprep.subr.bf16.mxu0 (!%p3632_p6), %v4327_v7 }
 0x48c   : > { %v3110_v14 = vpack.c.bf16 %v3045_v50, %v3044_v51 }
 0x48e   : > { %3778 = vmatpush3.bf16.msra.mxu1 %v3110_v14  ;;  %4044 = vmatpush3.bf16.msra.mxu0 (!%p3632_p6), %v4327_v7 }
 0x48f   : > { %4045 = vmatprep.subr.bf16.mxu0 (!%p3632_p6), %v4328_v52 }
 0x491   : > { %3627 = vmatmul.mubr.msk.bf16.vlgmr.msra.gmra.mrb[76].mxu1 %vm3626_vm11, %v5722_v46 }
 0x492   : > { %3629 = vmatprep.mubr.msk.bf16.mxu1 %vm3628_vm12, %v5722_v46  ;;  %4046 = vmatpush3.bf16.msra.mxu0 (!%p3632_p6), %v4328_v52 }
 0x493   : > { %4047 = vmatprep.subr.bf16.mxu0 (!%p3632_p6), %v4329_v10 }
 0x496   : > { %4048 = vmatpush3.bf16.msra.mxu0 (!%p3632_p6), %v4329_v10 }
 0x497   : > { %4049 = vmatprep.subr.bf16.mxu0 (!%p3632_p6), %v4330_v39 }
 0x499   : > { %3631 = vmatmul.mubr.msk.bf16.gmra.mrb[80].mxu1 %vm3630_vm15, %v5722_v46 }
 0x49a   : > { %4050 = vmatpush3.bf16.msra.mxu0 (!%p3632_p6), %v4330_v39 }
 0x49b   : > { %4051 = vmatprep.subr.bf16.mxu0 (!%p3632_p6), %v4331_v8 }
 0x49e   : > { %4052 = vmatpush3.bf16.msra.mxu0 (!%p3632_p6), %v4331_v8 }
 0x564   : > { %v3779_v37 = vpop.f32.mrb[76].mxu1 }
 0x565   : > { %v3780_v18 = vpop.f32.mrb[77].mxu1 }
 0x566   : > { %v3781_v21 = vadd.f32 %v3780_v18, %v3779_v37  ;;  %v3782_v23 = vpop.f32.mrb[78].mxu1 }
 0x567   : > { %v3783_v28 = vpop.f32.mrb[79].mxu1 }
 0x568   : > { %v3168_v12 = vadd.f32 %v3781_v21, %v3099_v49  ;;  %v3784_v31 = vadd.f32 %v3783_v28, %v3782_v23 }
 0x56a   : > { %3172 = vst [vmem:[#allocation2] sm:$0xff] %v3168_v12  ;;  %v3169_v61 = vadd.f32 %v3784_v31, %v3100_v34 }
 0x56c   : > { %3173 = vst [vmem:[#allocation2 + $0x8] sm:$0xff] %v3169_v61  ;;  %v3785_v42 = vpop.f32.mrb[80].mxu1 }
 0x56d   : > { %v3786_v5 = vpop.f32.mrb[81].mxu1 }
 0x56e   : > { %v3787_v38 = vadd.f32 %v3786_v5, %v3785_v42  ;;  %v3788_v19 = vpop.f32.mrb[82].mxu1  ;;  %3179 = sbr.rel (%p3632_p6) target bundleno = 1624 (0x658), region = 84 }
 0x56f   : > { %v3789_v1 = vpop.f32.mrb[83].mxu1 }
 0x570   : > { %v3170_v4 = vadd.f32 %v3787_v38, %v3101_v0  ;;  %v3790_v2 = vadd.f32 %v3789_v1, %v3788_v19 }
 0x571   : > { %v3184_v3 = vld [vmem:[#allocation2] sm:$0xff] (!%p3632_p6) }
 0x572   : > { %3174 = vst [vmem:[#allocation2 + $0x10] sm:$0xff] %v3170_v4  ;;  %v3171_v35 = vadd.f32 %v3790_v2, %v3102_v30 }
 0x573   : > { %v3185_v47 = vld [vmem:[#allocation2 + $0x8] sm:$0xff] (!%p3632_p6) }
 0x574   : > { %3175 = vst [vmem:[#allocation2 + $0x18] sm:$0xff] %v3171_v35  ;;  %v3188_v6 = vpack.c.bf16 (!%p3632_p6), %v3185_v47, %v3184_v3 }
 0x576   : > { %4053 = vmatprep.mubr.bf16.mxu0 %v3188_v6 }
 0x579   : > { %v3186_v33 = vld [vmem:[#allocation2 + $0x10] sm:$0xff] }
 0x57b   : > { %v3187_v58 = vld [vmem:[#allocation2 + $0x18] sm:$0xff] }
 0x57c   : > { %v3189_v43 = vpack.c.bf16 %v3187_v58, %v3186_v33 }
 0x57e   : > { %4054 = vmatmul.mubr.bf16.vlgmr.msra.gmra.mrb[0].mxu0 %v3189_v43 }
 0x651   : > { %v4055_v17 = vpop.f32.mrb[0].mxu0 }
 0x652   : > { %v3305_v22 = vadd.f32 %v4055_v17, %v3182_v63  ;;  %v3288_v57 = vpop.f32.mrb[1].mxu0 }
 0x653   : > { %v3303_v29 = vadd.f32 %v3288_v57, %v3180_v55  ;;  %v4056_v54 = vpop.f32.mrb[2].mxu0 }
 0x654   : > { %3309 = vst [vmem:[#allocation4 + $0x10] sm:$0xff] %v3305_v22  ;;  %v3306_v26 = vadd.f32 %v4056_v54, %v3183_v11  ;;  %v3291_v53 = vpop.f32.mrb[3].mxu0 }
 0x655   : > { %3307 = vst [vmem:[#allocation4] sm:$0xff] %v3303_v29  ;;  %v3304_v62 = vadd.f32 %v3291_v53, %v3181_v60 }
 0x656   : > { %3310 = vst [vmem:[#allocation4 + $0x18] sm:$0xff] %v3306_v26 }
 0x657   : > { %3308 = vst [vmem:[#allocation4 + $0x8] sm:$0xff] %v3304_v62 }
 0x658 PF: > { %p4129_p7 = scmp.eq.s32.totalorder %s4461_s16, 1  ;;  %s4374_s0 = smov [#allocation4]  }
 0x659   : > { %s3317_s23 = sshll.u32 %s4374_s0, 4  ;;  %s3318_s23 = int_to_ptr.vmem [resolvable:$true] %s3317_s23 }
 0x65a   : > { %s4332_s22 = scalar_lea.vmem %s3318_s23, 512  ;;  %p4339_p11 = scmp.lt.s32.totalorder %s3318_s23, %s3318_s23 }
 0x65b   : > { %p4333_p8 = scmp.ne.s32.totalorder %s3318_s23, %s4332_s22  ;;  %p4340_p12 = scmp.lt.s32.totalorder %s4332_s22, %s4332_s22 }
 0x65d   : > { %p4334_p9 = pnand %p4333_p8, %p4129_p7  ;;  %p4341_p13 = por %p4340_p12, %p4339_p11 }
 0x65f   : > { %p4335_p10 = pneg %p4334_p9 }
 0x661   : > { %p4342_p0 = pnand %p4341_p13, %p4335_p10 }
 0x663   : > { %4345 = shalt.err (!%p4342_p0)
}
 0x664   : > { %s4346_s10 = scalar_lea.hbm %s5557_s14, 512 }
 0x665   : > { %p4347_p1 = scmp.ne.s32.totalorder %s5557_s14, %s4346_s10  ;;  %p4352_p4 = scmp.lt.u32.totalorder %s4346_s10, %s5557_s14 }
 0x667   : > { %p4348_p2 = pnand %p4347_p1, %p4129_p7 }
 0x669   : > { %p4349_p3 = pneg %p4348_p2 }
 0x66b   : > { %p4354_p5 = pnand %p4352_p4, %p4349_p3 }
 0x66d   : > { %4357 = shalt.err (!%p4354_p5)
}
 0x66e   : > { %s4375_s30 = smov 128   ;;  %s4376_s18 = smov 8  }
 0x66f   : > { %4126 = dma.vmem_to_hbm [thread:$0]  (%p4129_p7), %s3318_s23, 512, %s5557_s14, [#allocation5], %s4375_s30, %s4375_s30, %s4376_s18  }
 0x670   : > { %4363 = dma.done.wait (%p4129_p7), [#allocation5], 512  }
 0x671   : > { %4365 = vsyncadd (%p4129_p7), [#allocation5], 4294966784 }
 0x672 PF: > { %s26_s15 = sadd.s32 1, %s4368_s15  }
 0x673   : > { %p23_p6 = scmp.ge.s32.totalorder %s26_s15, 4  }
 0x675   :  { %25 = sbr.rel (!%p23_p6) target bundleno = 4 (0x4), region = 120 }
 0x67c   :  { %3333 = vsyncpa [#allocation5], 1 }
 0x67d   :  { %3335 = vsyncpa [#allocation5 + $0x1], 1 }

</bundles_post_ra>
